<compile_context>
chip_gen: v7x
topology: tpu7x:2x2x1
jax: 0.10.0
libtpu: 0.0.40
codegen_flags: <defaults>
</compile_context>

<pallas_src>
import jax
import jax.numpy as jnp
from jax.experimental import pallas as pl
from jax.experimental.pallas import tpu as pltpu


def _round_up(x: int, m: int) -> int:
    return ((x + m - 1) // m) * m


def _nonlocal_bmm_kernel(w_ref, s_ref, o_ref):
    """One (b, n-tile, k-tile) step of  y[b, n] = sum_k w[b, n, k] * s[b, k]."""
    # w_ref: (1, TN, TK)  weight tile, native dtype
    # s_ref: (1, TK, 1)   source column tile
    # o_ref: (1, TN, 1)   f32 output tile; its block index ignores k, so it is
    #                     VMEM-resident across the whole K reduction.
    @pl.when(pl.program_id(2) == 0)
    def _():
        o_ref[...] = jnp.zeros_like(o_ref)

    o_ref[0] += jnp.dot(w_ref[0], s_ref[0], preferred_element_type=jnp.float32)


def non_local_block_2d(source, weight, *, tile_bytes=8 * 1024 * 1024, tn_cap=512):
    """Pallas TPU forward of NONLocalBlock2D.

    source: (B, C, H, W) float
    weight: dense (B, H*W, C*H*W) float  (torch sparse `.to_dense()` done by caller)
    returns: (B, 1, H, W) float32
    """
    B, C, H, W = source.shape
    N, K = H * W, C * H * W
    assert weight.shape == (B, N, K), (weight.shape, (B, N, K))

    if not jnp.issubdtype(weight.dtype, jnp.floating):
        weight = weight.astype(jnp.float32)
    w_itemsize = weight.dtype.itemsize
    sub_mult = {4: 8, 2: 16, 1: 32}.get(w_itemsize, 8)   # sublane tiling per dtype

    # Source is tiny (B*K elements); cast it to the weight dtype so the MXU runs
    # a homogeneous matmul.  Accumulation stays f32.
    src = source.reshape(B, K, 1).astype(weight.dtype)

    # ---- tile selection -----------------------------------------------------
    # TN: sublane dim of the weight tile (capped for megacore balance on v7x).
    # TK: lane / reduction dim, sized so the weight tile is ~tile_bytes.
    tn = min(tn_cap, _round_up(N, sub_mult))
    n_pad = _round_up(N, tn)
    tk = max(128, (tile_bytes // (tn * w_itemsize)) // 128 * 128)
    tk = min(tk, _round_up(K, 128))
    k_pad = _round_up(K, tk)

    if n_pad != N or k_pad != K:
        # TODO(synk): fallback zero-pad copies `weight` once through HBM; the
        # spec'd shapes (e.g. (3,136,32,32)) divide exactly and skip this path.
        weight = jnp.pad(weight, ((0, 0), (0, n_pad - N), (0, k_pad - K)))
        src = jnp.pad(src, ((0, 0), (0, k_pad - K), (0, 0)))

    grid = (B, n_pad // tn, k_pad // tk)   # reduction axis innermost

    # Double-buffered VMEM footprint (lane dims of size 1 pad to 128 lanes).
    vmem_needed = (2 * tn * tk * w_itemsize          # weight tiles
                   + 2 * tk * 128 * w_itemsize       # source column tiles
                   + 2 * tn * 128 * 4)               # f32 output tiles
    vmem_limit = min(64 * 1024 * 1024, max(vmem_needed + (8 << 20), 24 << 20))

    cost = pl.CostEstimate(
        flops=2 * B * n_pad * k_pad,
        transcendentals=0,
        bytes_accessed=(B * n_pad * k_pad * w_itemsize
                        + B * k_pad * w_itemsize
                        + B * n_pad * 4),
    )

    out = pl.pallas_call(
        _nonlocal_bmm_kernel,
        out_shape=jax.ShapeDtypeStruct((B, n_pad, 1), jnp.float32),
        grid=grid,
        in_specs=[
            pl.BlockSpec((1, tn, tk), lambda b, i, k: (b, i, k)),   # weight tile
            pl.BlockSpec((1, tk, 1), lambda b, i, k: (b, k, 0)),    # source column
        ],
        out_specs=pl.BlockSpec((1, tn, 1), lambda b, i, k: (b, i, 0)),
        compiler_params=pltpu.CompilerParams(
            dimension_semantics=("parallel", "parallel", "arbitrary"),
            vmem_limit_bytes=vmem_limit,
        ),
        cost_estimate=cost,
    )(weight, src)

    # (B, N_pad, 1) -> (B, 1, H, W)   (row-major; matches torch permute+view)
    return out[:, :N, 0].reshape(B, 1, H, W)


def _non_local_ref(source, weight):
    """Pure-JAX reference matching the PyTorch forward."""
    B, C, H, W = source.shape
    g = source.reshape(B, 1, -1).transpose(0, 2, 1)                  # (B, K, 1)
    y = jnp.matmul(weight, g, precision=jax.lax.Precision.HIGHEST)   # (B, N, 1)
    return y.transpose(0, 2, 1).reshape(B, 1, H, W)


if __name__ == "__main__":
    key = jax.random.PRNGKey(0)
    k1, k2 = jax.random.split(key)

    # Small shapes consistent with the module: batch=2, channels=4, spatial=16.
    B, C, H, W = 2, 4, 16, 16
    N, K = H * W, C * H * W
    source = jax.random.normal(k1, (B, C, H, W), dtype=jnp.float32)
    # TODO(synk): the module's `weight` is a torch sparse tensor (.to_dense());
    # here we build the dense equivalent directly.
    weight = jax.random.normal(k2, (B, N, K), dtype=jnp.float32) * 0.05

    y = jax.block_until_ready(non_local_block_2d(source, weight))
    y_ref = _non_local_ref(source, weight)

    assert y.shape == (B, 1, H, W), y.shape
    assert jnp.allclose(y, y_ref, rtol=2e-3, atol=2e-3), float(jnp.max(jnp.abs(y - y_ref)))

    print("KERNEL_OK")
</pallas_src>

<mosaic_0001>
module attributes {stable_mosaic.version = 11 : i64} {
  func.func @_nonlocal_bmm_kernel(%arg0: i32, %arg1: i32, %arg2: i32, %arg3: memref<1x256x1024xf32, #tpu.memory_space<vmem>>, %arg4: memref<1x1024x1xf32, #tpu.memory_space<vmem>>, %arg5: memref<1x256x1xf32, #tpu.memory_space<vmem>>) attributes {dimension_semantics = [#tpu.dimension_semantics<parallel>, #tpu.dimension_semantics<parallel>, #tpu.dimension_semantics<arbitrary>], iteration_bounds = array<i64: 2, 1, 1>, scalar_prefetch = 0 : i64, scratch_operands = 0 : i64, tpu.core_type = #tpu.core_type<tc>, window_params = [{transform_indices = @transform_0, window_bounds = array<i64: 1, 256, 1024>}, {transform_indices = @transform_1, window_bounds = array<i64: 1, 1024, 1>}, {transform_indices = @transform_2, window_bounds = array<i64: 1, 256, 1>}]} {
    %c0_i32 = arith.constant 0 : i32
    %0 = arith.cmpi eq, %arg2, %c0_i32 : i32
    %1 = arith.extui %0 : i1 to i32
    %c0_i32_0 = arith.constant 0 : i32
    %2 = arith.cmpi ne, %1, %c0_i32_0 : i32
    scf.if %2 {
      %cst_12 = arith.constant 0.000000e+00 : f32
      %14 = vector.broadcast %cst_12 : f32 to vector<1x256x1xf32>
      %c0_13 = arith.constant 0 : index
      %c0_14 = arith.constant 0 : index
      %c0_15 = arith.constant 0 : index
      %15 = vector.load %arg5[%c0_13, %c0_14, %c0_15] : memref<1x256x1xf32, #tpu.memory_space<vmem>>, vector<1x256x1xf32>
      tpu.vector_store %arg5[%c0_13, %c0_14, %c0_15], %14 {strides = array<i32>} : memref<1x256x1xf32, #tpu.memory_space<vmem>>, vector<1x256x1xf32>,
    } else {
    }
    %c0 = arith.constant 0 : index
    %c0_1 = arith.constant 0 : index
    %c0_2 = arith.constant 0 : index
    %3 = vector.load %arg5[%c0, %c0_1, %c0_2] : memref<1x256x1xf32, #tpu.memory_space<vmem>>, vector<1x256x1xf32>
    %4 = vector.shape_cast %3 : vector<1x256x1xf32> to vector<256x1xf32>
    %c0_3 = arith.constant 0 : index
    %c0_4 = arith.constant 0 : index
    %c0_5 = arith.constant 0 : index
    %5 = vector.load %arg3[%c0_3, %c0_4, %c0_5] : memref<1x256x1024xf32, #tpu.memory_space<vmem>>, vector<1x256x1024xf32>
    %6 = vector.shape_cast %5 : vector<1x256x1024xf32> to vector<256x1024xf32>
    %c0_6 = arith.constant 0 : index
    %c0_7 = arith.constant 0 : index
    %c0_8 = arith.constant 0 : index
    %7 = vector.load %arg4[%c0_6, %c0_7, %c0_8] : memref<1x1024x1xf32, #tpu.memory_space<vmem>>, vector<1x1024x1xf32>
    %8 = vector.shape_cast %7 : vector<1x1024x1xf32> to vector<1024x1xf32>
    %cst = arith.constant dense<0.000000e+00> : vector<256x1xf32>
    %9 = tpu.matmul %6, %8, %cst {dimension_numbers = #tpu.dot_dimension_numbers<[1], [0], [0], [1], [0, 0, 1, 1], [], []>} : vector<256x1024xf32>, vector<1024x1xf32>, vector<256x1xf32> -> vector<256x1xf32>
    %10 = arith.addf %4, %9 : vector<256x1xf32>
    %c0_9 = arith.constant 0 : index
    %c0_10 = arith.constant 0 : index
    %c0_11 = arith.constant 0 : index
    %11 = vector.load %arg5[%c0_9, %c0_10, %c0_11] : memref<1x256x1xf32, #tpu.memory_space<vmem>>, vector<1x256x1xf32>
    %12 = vector.shape_cast %11 : vector<1x256x1xf32> to vector<256x1xf32>
    %13 = vector.shape_cast %10 : vector<256x1xf32> to vector<1x256x1xf32>
    tpu.vector_store %arg5[%c0_9, %c0_10, %c0_11], %13 {strides = array<i32>} : memref<1x256x1xf32, #tpu.memory_space<vmem>>, vector<1x256x1xf32>,
    return
  }
  func.func @transform_0(%arg0: i32, %arg1: i32, %arg2: i32) -> (i32, i32, i32) {
    %c0_i32 = arith.constant 0 : i32
    return %arg0, %arg1, %arg2 : i32, i32, i32
  }
  func.func @transform_1(%arg0: i32, %arg1: i32, %arg2: i32) -> (i32, i32, i32) {
    %c0_i32 = arith.constant 0 : i32
    %c0_i32_0 = arith.constant 0 : i32
    return %arg0, %arg2, %c0_i32 : i32, i32, i32
  }
  func.func @transform_2(%arg0: i32, %arg1: i32, %arg2: i32) -> (i32, i32, i32) {
    %c0_i32 = arith.constant 0 : i32
    %c0_i32_0 = arith.constant 0 : i32
    return %arg0, %arg1, %c0_i32 : i32, i32, i32
  }
}

</mosaic_0001>

<bundles_post_ra>
// kernel: tpu_custom_call.1
= control target key start
LH: loop header
LB: loop body
LE: loop exit
PB: predicated region body
PF: predicated region fallthrough
CT: control target
= control target key end

     0   :  { %7 = vsyncpa [#allocation3], 0  ;;  %s2989_s0 = inlined_call_operand.hbm [shape: f32[2,256,1024], index: 0, kind: input, shape index: {}]   ;;  %s2990_s1 = inlined_call_operand.vmem [shape: f32[2,1024,1], index: 1, kind: input, shape index: {}]   ;;  %s2991_s2 = inlined_call_operand.vmem [shape: f32[2,256,1], index: 2, kind: output, shape index: {}]  }
   0x1   :  { %9 = vsyncpa [#allocation3 + $0x1], 0  ;;  %s2148_s9 = smov 0   ;;  %s2150_s10 = smov 0  }
   0x2   :  { %s2152_s11 = smov 0   ;;  %s2154_s12 = smov 0  }
   0x3   :  { %s2156_s13 = smov 0   ;;  %s2158_s14 = smov 0  }
   0x4 LB: > { %s1777_s15 = sadd.s32 4294967295, %s2126_s14   ;;  %s34_s16 = sadd.s32 1, %s2122_s13  ;;  %s2126_s14 = sphi %s2158_s14, %s15_s14   ;;  %s2122_s13 = sphi %s2156_s13, %s2999_s13   ;;  %s2118_s12 = sphi %s2154_s12, %s2998_s12   ;;  %s2114_s11 = sphi %s2152_s11, %s2997_s11   ;;  %s2110_s10 = sphi %s2150_s10, %s2996_s10   ;;  %s2106_s9 = sphi %s2148_s9, %s2995_s9  }
   0x5   : > { %p36_p0 = scmp.ge.s32.totalorder %s34_s16, 2  ;;  %s45_s17 = sadd.s32 1, %s2114_s11 }
   0x6   : > { %p52_p1 = scmp.ne.s32.totalorder %s2114_s11, %s2110_s10  ;;  %p53_p2 = scmp.eq.s32.totalorder %s2126_s14, 0 }
   0x7   : > { %s3001_s16 = smov (%p36_p0, %s34_s16), 0  ;;  %p58_p4 = scmp.ne.s32.totalorder %s2110_s10, %s2106_s9 }
   0x8   : > { %p2184_p3 = por %p53_p2, %p52_p1  ;;  %s38_s19 = ssub.s32 %s2122_s13, %s3001_s16 }
   0x9   : > { %p59_p5 = scmp.eq.s32.totalorder %s1777_s15, 0  ;;  %p43_p6 = scmp.eq.s32.totalorder %s38_s19, 0 }
   0xa   : > { %p1993_p8 = scmp.lt.s32.totalorder %s2126_s14, 2  ;;  %s138_s22 = sand.u32 1, %s2114_s11  }
   0xb   : > { %p2191_p7 = por %p59_p5, %p58_p4  ;;  %s1792_s23 = sshll.u32 %s2122_s13, 15 }
   0xc   : > { %s2197_s21 = scalar_select %p43_p6, %s2114_s11, %s45_s17  }
   0xd   : > { %s1781_s24 = sshll.u32 %s138_s22, 11  ;;  %s2204_s27 = scalar_lea.hbm %s2989_s0, %s1792_s23 }
   0xe   : > { %s142_s28 = scalar_lea.vmem [#allocation2], %s1781_s24  ;;  %p2208_p9 = pnand %p1993_p8, %p2184_p3 }
   0xf   : > { %s154_s29 = sshll.u32 %s142_s28, 4  ;;  %s2214_s3 = scalar_lea.sflag [#allocation3], %s138_s22  ;;  %s2212_s29 = int_to_ptr.vmem [resolvable:$true] %s154_s29 }
  0x10   : > { %s2046_s4 = scalar_lea.hbm %s2204_s27, 32768  ;;  %p2048_p11 = pneg %p2208_p9 }
  0x11   : > { %p2047_p10 = scmp.ne.s32.totalorder %s2204_s27, %s2046_s4  ;;  %s2051_s7 = scalar_lea.hbm %s2989_s0, 65536 }
  0x12   : > { %p2052_p0 = scmp.lt.u32.totalorder %s2204_s27, %s2989_s0  ;;  %p2053_p1 = scmp.lt.u32.totalorder %s2051_s7, %s2046_s4 }
  0x13   : > { %p2049_p12 = pnand %p2048_p11, %p2047_p10  ;;  %p2055_p3 = scmp.lt.u32.totalorder %s2046_s4, %s2204_s27 }
  0x14   : > { %p2054_p2 = por %p2053_p1, %p2052_p0 }
  0x15   : > { %p2050_p13 = pneg %p2049_p12 }
  0x16   : > { %p2056_p4 = por %p2055_p3, %p2054_p2 }
  0x18   : > { %p2057_p5 = pnand %p2056_p4, %p2050_p13 }
  0x1a   : > { %2060 = shalt.err (!%p2057_p5)
}
  0x1b   : > { %s2061_s15 = scalar_lea.vmem %s2212_s29, 32768  ;;  %s2128_s17 = smov [#allocation2]  }
  0x1c   : > { %p2062_p6 = scmp.ne.s32.totalorder %s2212_s29, %s2061_s15  ;;  %s2066_s18 = sshll.u32 %s2128_s17, 4  ;;  %s2067_s18 = int_to_ptr.vmem [resolvable:$false] %s2066_s18 }
  0x1d   : > { %s2068_s19 = scalar_lea.vmem %s2067_s18, 65536  ;;  %p2069_p12 = scmp.lt.s32.totalorder %s2212_s29, %s2067_s18 }
  0x1e   : > { %p2064_p8 = pnand %p2062_p6, %p2048_p11  ;;  %p2070_p0 = scmp.lt.s32.totalorder %s2068_s19, %s2061_s15 }
  0x20   : > { %p2065_p10 = pneg %p2064_p8  ;;  %p2071_p1 = por %p2070_p0, %p2069_p12 }
  0x22   : > { %p2072_p2 = pnand %p2071_p1, %p2065_p10 }
  0x24   : > { %2075 = shalt.err (!%p2072_p2)
}
  0x25   : > { %s2129_s22 = smov 1024   ;;  %s2130_s23 = smov 64  }
  0x26   : > { %1992 = dma.hbm_to_vmem [thread:$0]  (!%p2208_p9), %s2204_s27, 32768, %s2212_s29, %s2214_s3, %s2129_s22, %s2129_s22, %s2130_s23  }
  0x27   : > { %p1784_p11 = scmp.ge.s32.totalorder %s2126_s14, 1  ;;  %p175_p13 = scmp.lt.s32.totalorder %s2126_s14, 3 }
  0x29   : > { %p176_p3 = pnand %p1784_p11, %p175_p13 }
  0x2a   : > { %s181_s24 = sand.u32 (!%p176_p3), 1, %s2110_s10  }
  0x2b   : > { %179 = sbr.rel (%p176_p3) target bundleno = 593 (0x251), region = 28  ;;  %s1785_s25 = sshll.u32 (!%p176_p3), %s181_s24, 11 }
  0x2c   : > { %s182_s26 = scalar_lea.sflag (!%p176_p3), [#allocation3], %s181_s24  ;;  %s2245_s28 = scalar_lea.vmem (!%p176_p3), [#allocation2], %s1785_s25 }
  0x32   : > { %2101 = dma.done.wait (%p2191_p7), %s182_s26, 32768  }
  0x33   : > { %2103 = vsyncadd (%p2191_p7), %s182_s26, 4294934528  ;;  %p222_p4 = scmp.lt.s32.totalorder %s2118_s12, 1  ;;  %v2131_v0 = vmov 0.0|0.0   ;;  %v311_v41 = vld [vmem:[%s2245_s28 + $0x8] sm:$0xff]  ;;  %v313_v42 = vld [vmem:[%s2245_s28 + $0x18] sm:$0xff]  ;;  %vm245_vm0 = vcmask 7168  }
  0x34   : > { %1795 = vmatprep.subr.bf16.mxu0 %v2131_v0  ;;  %1843 = vmatprep.subr.bf16.mxu1 %v2131_v0 }
  0x35   : > { %s3003_s12 = smov (!%p222_p4, %s2118_s12), 1  ;;  %758 = vmatprep.mubr.f32.mxu0 %v311_v41  ;;  %983 = vmatprep.mubr.f32.mxu1 %v313_v42  ;;  %v312_v42 = vld [vmem:[%s2245_s28 + $0x10] sm:$0xff] }
  0x36   : > { %s1793_s27 = sshll.u32 %s3003_s12, 10  ;;  %s1794_s20 = sshll.u32 %s3003_s12, 8 }
  0x37   : > { %s2261_s3 = scalar_lea.vmem %s2990_s1, %s1793_s27  ;;  %s2671_s6 = scalar_lea.vmem %s2991_s2, %s1794_s20 }
  0x38   : > { %v566_v1 = vld [vmem:[%s2261_s3] sm:$0xff]  ;;  %v567_v2 = vld [vmem:[%s2261_s3 + $0x8] sm:$0xff]  ;;  %v568_v6 = vld [vmem:[%s2261_s3 + $0x10] sm:$0xff] }
  0x39   : > { %v598_v3 = vld [vmem:[%s2261_s3 + $0x100] sm:$0xff]  ;;  %v1796_v4 = vpack.c.bf16 %v567_v2, %v566_v1  ;;  %v599_v5 = vld [vmem:[%s2261_s3 + $0x108] sm:$0xff]  ;;  %v569_v7 = vld [vmem:[%s2261_s3 + $0x18] sm:$0xff] }
  0x3a   : > { %v1844_v8 = vpack.c.bf16 %v599_v5, %v598_v3  ;;  %v600_v9 = vld [vmem:[%s2261_s3 + $0x110] sm:$0xff]  ;;  %v601_v10 = vld [vmem:[%s2261_s3 + $0x118] sm:$0xff]  ;;  %v1799_v11 = vpack.c.bf16 %v569_v7, %v568_v6  ;;  %v570_v13 = vld [vmem:[%s2261_s3 + $0x20] sm:$0xff] }
  0x3b   : > { %1797 = vmatpush1.bf16.msra.mxu0 %v1796_v4  ;;  %v1847_v12 = vpack.c.bf16 %v601_v10, %v600_v9  ;;  %v571_v14 = vld [vmem:[%s2261_s3 + $0x28] sm:$0xff]  ;;  %v602_v15 = vld [vmem:[%s2261_s3 + $0x120] sm:$0xff]  ;;  %v572_v19 = vld [vmem:[%s2261_s3 + $0x30] sm:$0xff] }
  0x3c   : > { %1845 = vmatpush1.bf16.msra.mxu1 %v1844_v8  ;;  %1798 = vmatprep.subr.bf16.mxu0 %v2131_v0  ;;  %v603_v16 = vld [vmem:[%s2261_s3 + $0x128] sm:$0xff]  ;;  %v1802_v17 = vpack.c.bf16 %v571_v14, %v570_v13  ;;  %v573_v20 = vld [vmem:[%s2261_s3 + $0x38] sm:$0xff]  ;;  %v604_v21 = vld [vmem:[%s2261_s3 + $0x130] sm:$0xff] }
  0x3d   : > { %1846 = vmatprep.subr.bf16.mxu1 %v2131_v0  ;;  %v1850_v18 = vpack.c.bf16 %v603_v16, %v602_v15  ;;  %v605_v22 = vld [vmem:[%s2261_s3 + $0x138] sm:$0xff]  ;;  %v1805_v23 = vpack.c.bf16 %v573_v20, %v572_v19  ;;  %v574_v25 = vld [vmem:[%s2261_s3 + $0x40] sm:$0xff]  ;;  %v575_v26 = vld [vmem:[%s2261_s3 + $0x48] sm:$0xff] }
  0x3e   : > { %v1853_v24 = vpack.c.bf16 %v605_v22, %v604_v21  ;;  %v606_v27 = vld [vmem:[%s2261_s3 + $0x140] sm:$0xff]  ;;  %v607_v28 = vld [vmem:[%s2261_s3 + $0x148] sm:$0xff]  ;;  %v1808_v29 = vpack.c.bf16 %v575_v26, %v574_v25  ;;  %v576_v31 = vld [vmem:[%s2261_s3 + $0x50] sm:$0xff] }
  0x3f   : > { %1800 = vmatpush1.bf16.msra.mxu0 %v1799_v11  ;;  %v1856_v30 = vpack.c.bf16 %v607_v28, %v606_v27  ;;  %v577_v32 = vld [vmem:[%s2261_s3 + $0x58] sm:$0xff]  ;;  %v608_v33 = vld [vmem:[%s2261_s3 + $0x150] sm:$0xff]  ;;  %v578_v37 = vld [vmem:[%s2261_s3 + $0x60] sm:$0xff] }
  0x40   : > { %1848 = vmatpush1.bf16.msra.mxu1 %v1847_v12  ;;  %1801 = vmatprep.subr.bf16.mxu0 %v2131_v0  ;;  %v609_v34 = vld [vmem:[%s2261_s3 + $0x158] sm:$0xff]  ;;  %v1811_v35 = vpack.c.bf16 %v577_v32, %v576_v31  ;;  %v579_v38 = vld [vmem:[%s2261_s3 + $0x68] sm:$0xff]  ;;  %v610_v39 = vld [vmem:[%s2261_s3 + $0x160] sm:$0xff] }
  0x41   : > { %1849 = vmatprep.subr.bf16.mxu1 %v2131_v0  ;;  %v1859_v36 = vpack.c.bf16 %v609_v34, %v608_v33  ;;  %v611_v40 = vld [vmem:[%s2261_s3 + $0x168] sm:$0xff]  ;;  %v1814_v43 = vpack.c.bf16 %v579_v38, %v578_v37  ;;  %v580_v45 = vld [vmem:[%s2261_s3 + $0x70] sm:$0xff]  ;;  %v581_v46 = vld [vmem:[%s2261_s3 + $0x78] sm:$0xff] }
  0x42   : > { %v1862_v44 = vpack.c.bf16 %v611_v40, %v610_v39  ;;  %v612_v47 = vld [vmem:[%s2261_s3 + $0x170] sm:$0xff]  ;;  %v613_v48 = vld [vmem:[%s2261_s3 + $0x178] sm:$0xff]  ;;  %v1817_v49 = vpack.c.bf16 %v581_v46, %v580_v45  ;;  %v582_v51 = vld [vmem:[%s2261_s3 + $0x80] sm:$0xff] }
  0x43   : > { %1803 = vmatpush1.bf16.msra.mxu0 %v1802_v17  ;;  %v1865_v50 = vpack.c.bf16 %v613_v48, %v612_v47  ;;  %v583_v52 = vld [vmem:[%s2261_s3 + $0x88] sm:$0xff]  ;;  %v614_v53 = vld [vmem:[%s2261_s3 + $0x180] sm:$0xff]  ;;  %v584_v57 = vld [vmem:[%s2261_s3 + $0x90] sm:$0xff] }
  0x44   : > { %1851 = vmatpush1.bf16.msra.mxu1 %v1850_v18  ;;  %1804 = vmatprep.subr.bf16.mxu0 %v2131_v0  ;;  %v615_v54 = vld [vmem:[%s2261_s3 + $0x188] sm:$0xff]  ;;  %v1820_v55 = vpack.c.bf16 %v583_v52, %v582_v51  ;;  %v585_v58 = vld [vmem:[%s2261_s3 + $0x98] sm:$0xff]  ;;  %v616_v59 = vld [vmem:[%s2261_s3 + $0x190] sm:$0xff] }
  0x45   : > { %1852 = vmatprep.subr.bf16.mxu1 %v2131_v0  ;;  %v1868_v56 = vpack.c.bf16 %v615_v54, %v614_v53  ;;  %v617_v60 = vld [vmem:[%s2261_s3 + $0x198] sm:$0xff]  ;;  %v1823_v61 = vpack.c.bf16 %v585_v58, %v584_v57  ;;  %v586_v63 = vld [vmem:[%s2261_s3 + $0xa0] sm:$0xff]  ;;  %v587_v1 = vld [vmem:[%s2261_s3 + $0xa8] sm:$0xff] }
  0x46   : > { %v1871_v62 = vpack.c.bf16 %v617_v60, %v616_v59  ;;  %v618_v2 = vld [vmem:[%s2261_s3 + $0x1a0] sm:$0xff]  ;;  %v619_v3 = vld [vmem:[%s2261_s3 + $0x1a8] sm:$0xff]  ;;  %v1826_v4 = vpack.c.bf16 %v587_v1, %v586_v63  ;;  %v588_v6 = vld [vmem:[%s2261_s3 + $0xb0] sm:$0xff] }
  0x47   : > { %1806 = vmatpush1.bf16.msra.mxu0 %v1805_v23  ;;  %v1874_v5 = vpack.c.bf16 %v619_v3, %v618_v2  ;;  %v589_v7 = vld [vmem:[%s2261_s3 + $0xb8] sm:$0xff]  ;;  %v620_v8 = vld [vmem:[%s2261_s3 + $0x1b0] sm:$0xff]  ;;  %v590_v12 = vld [vmem:[%s2261_s3 + $0xc0] sm:$0xff] }
  0x48   : > { %1854 = vmatpush1.bf16.msra.mxu1 %v1853_v24  ;;  %1807 = vmatprep.subr.bf16.mxu0 %v2131_v0  ;;  %v621_v9 = vld [vmem:[%s2261_s3 + $0x1b8] sm:$0xff]  ;;  %v1829_v10 = vpack.c.bf16 %v589_v7, %v588_v6  ;;  %v591_v13 = vld [vmem:[%s2261_s3 + $0xc8] sm:$0xff]  ;;  %v622_v14 = vld [vmem:[%s2261_s3 + $0x1c0] sm:$0xff] }
  0x49   : > { %1855 = vmatprep.subr.bf16.mxu1 %v2131_v0  ;;  %v1877_v11 = vpack.c.bf16 %v621_v9, %v620_v8  ;;  %v623_v15 = vld [vmem:[%s2261_s3 + $0x1c8] sm:$0xff]  ;;  %v1832_v16 = vpack.c.bf16 %v591_v13, %v590_v12  ;;  %v592_v18 = vld [vmem:[%s2261_s3 + $0xd0] sm:$0xff]  ;;  %v593_v19 = vld [vmem:[%s2261_s3 + $0xd8] sm:$0xff] }
  0x4a   : > { %v1880_v17 = vpack.c.bf16 %v623_v15, %v622_v14  ;;  %v624_v20 = vld [vmem:[%s2261_s3 + $0x1d0] sm:$0xff]  ;;  %v625_v21 = vld [vmem:[%s2261_s3 + $0x1d8] sm:$0xff]  ;;  %v1835_v22 = vpack.c.bf16 %v593_v19, %v592_v18  ;;  %v594_v24 = vld [vmem:[%s2261_s3 + $0xe0] sm:$0xff] }
  0x4b   : > { %1809 = vmatpush1.bf16.msra.mxu0 %v1808_v29  ;;  %v1883_v23 = vpack.c.bf16 %v625_v21, %v624_v20  ;;  %v595_v25 = vld [vmem:[%s2261_s3 + $0xe8] sm:$0xff]  ;;  %v626_v26 = vld [vmem:[%s2261_s3 + $0x1e0] sm:$0xff]  ;;  %v597_v31 = vld [vmem:[%s2261_s3 + $0xf8] sm:$0xff] }
  0x4c   : > { %1857 = vmatpush1.bf16.msra.mxu1 %v1856_v30  ;;  %1810 = vmatprep.subr.bf16.mxu0 %v2131_v0  ;;  %v627_v27 = vld [vmem:[%s2261_s3 + $0x1e8] sm:$0xff]  ;;  %v1838_v28 = vpack.c.bf16 %v595_v25, %v594_v24  ;;  %v596_v30 = vld [vmem:[%s2261_s3 + $0xf0] sm:$0xff]  ;;  %v629_v33 = vld [vmem:[%s2261_s3 + $0x1f8] sm:$0xff] }
  0x4d   : > { %1858 = vmatprep.subr.bf16.mxu1 %v2131_v0  ;;  %v1886_v29 = vpack.c.bf16 %v627_v27, %v626_v26  ;;  %v628_v32 = vld [vmem:[%s2261_s3 + $0x1f0] sm:$0xff]  ;;  %v1841_v34 = vpack.c.bf16 %v597_v31, %v596_v30  ;;  %v631_v37 = vld [vmem:[%s2261_s3 + $0x208] sm:$0xff]  ;;  %v662_v38 = vld [vmem:[%s2261_s3 + $0x300] sm:$0xff] }
  0x4e   : > { %v663_v39 = vld [vmem:[%s2261_s3 + $0x308] sm:$0xff]  ;;  %v310_v40 = vld [vmem:[%s2245_s28] sm:$0xff]  ;;  %v632_v45 = vld [vmem:[%s2261_s3 + $0x210] sm:$0xff] }
  0x4f   : > { %1812 = vmatpush1.bf16.msra.mxu0 %v1811_v35  ;;  %v1889_v35 = vpack.c.bf16 %v629_v33, %v628_v32  ;;  %v633_v46 = vld [vmem:[%s2261_s3 + $0x218] sm:$0xff]  ;;  %v664_v48 = vld [vmem:[%s2261_s3 + $0x310] sm:$0xff]  ;;  %v327_v52 = vld [vmem:[%s2245_s28 + $0x88] sm:$0xff] }
  0x50   : > { %1860 = vmatpush1.bf16.msra.mxu1 %v1859_v36  ;;  %1813 = vmatprep.subr.bf16.mxu0 %v2131_v0  ;;  %v630_v36 = vld [vmem:[%s2261_s3 + $0x200] sm:$0xff]  ;;  %v321_v47 = vld [vmem:[%s2245_s28 + $0x58] sm:$0xff]  ;;  %v320_v51 = vld [vmem:[%s2245_s28 + $0x50] sm:$0xff]  ;;  %v1895_v53 = vpack.c.bf16 %v633_v46, %v632_v45 }
  0x51   : > { %1861 = vmatprep.subr.bf16.mxu1 %v2131_v0  ;;  %v1892_v41 = vpack.c.bf16 %v631_v37, %v630_v36  ;;  %v329_v54 = vld [vmem:[%s2245_s28 + $0x98] sm:$0xff]  ;;  %v635_v57 = vld [vmem:[%s2261_s3 + $0x228] sm:$0xff]  ;;  %v666_v58 = vld [vmem:[%s2261_s3 + $0x320] sm:$0xff] }
  0x52   : > { %v667_v59 = vld [vmem:[%s2261_s3 + $0x328] sm:$0xff]  ;;  %v326_v60 = vld [vmem:[%s2245_s28 + $0x80] sm:$0xff]  ;;  %v337_v1 = vld [vmem:[%s2245_s28 + $0xd8] sm:$0xff] }
  0x53   : > { %1815 = vmatpush1.bf16.msra.mxu0 %v1814_v43  ;;  %v1940_v43 = vpack.c.bf16 %v663_v39, %v662_v38  ;;  %v1946_v2 = vpack.c.bf16 %v667_v59, %v666_v58  ;;  %v636_v3 = vld [vmem:[%s2261_s3 + $0x230] sm:$0xff]  ;;  %v669_v6 = vld [vmem:[%s2261_s3 + $0x338] sm:$0xff]  ;;  %v334_v7 = vld [vmem:[%s2245_s28 + $0xc0] sm:$0xff] }
  0x54   : > { %1863 = vmatpush1.bf16.msra.mxu1 %v1862_v44  ;;  %1816 = vmatprep.subr.bf16.mxu0 %v2131_v0  ;;  %v319_v44 = vld [vmem:[%s2245_s28 + $0x48] sm:$0xff]  ;;  %v336_v8 = vld [vmem:[%s2245_s28 + $0xd0] sm:$0xff]  ;;  %v638_v13 = vld [vmem:[%s2261_s3 + $0x240] sm:$0xff] }
  0x55   : > { %1864 = vmatprep.subr.bf16.mxu1 %v2131_v0  ;;  %v343_v9 = vld [vmem:[%s2245_s28 + $0x108] sm:$0xff]  ;;  %v670_v15 = vld [vmem:[%s2261_s3 + $0x340] sm:$0xff]  ;;  %v344_v18 = vld [vmem:[%s2245_s28 + $0x110] sm:$0xff] }
  0x56   : > { %v639_v14 = vld [vmem:[%s2261_s3 + $0x248] sm:$0xff]  ;;  %v353_v21 = vld [vmem:[%s2245_s28 + $0x158] sm:$0xff]  ;;  %v672_v25 = vld [vmem:[%s2261_s3 + $0x350] sm:$0xff] }
  0x57   : > { %1818 = vmatpush1.bf16.msra.mxu0 %v1817_v49  ;;  %v665_v49 = vld [vmem:[%s2261_s3 + $0x318] sm:$0xff]  ;;  %v351_v19 = vld [vmem:[%s2245_s28 + $0x148] sm:$0xff]  ;;  %v1904_v20 = vpack.c.bf16 %v639_v14, %v638_v13  ;;  %v350_v27 = vld [vmem:[%s2245_s28 + $0x140] sm:$0xff] }
  0x58   : > { %1866 = vmatpush1.bf16.msra.mxu1 %v1865_v50  ;;  %1819 = vmatprep.subr.bf16.mxu0 %v2131_v0  ;;  %v318_v50 = vld [vmem:[%s2245_s28 + $0x40] sm:$0xff]  ;;  %v641_v24 = vld [vmem:[%s2261_s3 + $0x258] sm:$0xff]  ;;  %v675_v36 = vld [vmem:[%s2261_s3 + $0x368] sm:$0xff] }
  0x59   : > { %1867 = vmatprep.subr.bf16.mxu1 %v2131_v0  ;;  %v673_v26 = vld [vmem:[%s2261_s3 + $0x358] sm:$0xff]  ;;  %v642_v33 = vld [vmem:[%s2261_s3 + $0x260] sm:$0xff]  ;;  %v360_v38 = vld [vmem:[%s2245_s28 + $0x190] sm:$0xff] }
  0x5a   : > { %v361_v31 = vld [vmem:[%s2245_s28 + $0x198] sm:$0xff]  ;;  %v1955_v32 = vpack.c.bf16 %v673_v26, %v672_v25  ;;  %v358_v37 = vld [vmem:[%s2245_s28 + $0x180] sm:$0xff]  ;;  %v367_v39 = vld [vmem:[%s2245_s28 + $0x1c8] sm:$0xff] }
  0x5b   : > { %1821 = vmatpush1.bf16.msra.mxu0 %v1820_v55  ;;  %v1943_v55 = vpack.c.bf16 %v665_v49, %v664_v48  ;;  %v676_v45 = vld [vmem:[%s2261_s3 + $0x370] sm:$0xff]  ;;  %v677_v46 = vld [vmem:[%s2261_s3 + $0x378] sm:$0xff]  ;;  %v375_v49 = vld [vmem:[%s2245_s28 + $0x208] sm:$0xff] }
  0x5c   : > { %1869 = vmatpush1.bf16.msra.mxu1 %v1868_v56  ;;  %1822 = vmatprep.subr.bf16.mxu0 %v2131_v0  ;;  %v634_v56 = vld [vmem:[%s2261_s3 + $0x220] sm:$0xff]  ;;  %v368_v48 = vld [vmem:[%s2245_s28 + $0x1d0] sm:$0xff]  ;;  %v383_v59 = vld [vmem:[%s2245_s28 + $0x248] sm:$0xff] }
  0x5d   : > { %1870 = vmatprep.subr.bf16.mxu1 %v2131_v0  ;;  %v1898_v63 = vpack.c.bf16 %v635_v57, %v634_v56  ;;  %v679_v56 = vld [vmem:[%s2261_s3 + $0x388] sm:$0xff]  ;;  %v374_v57 = vld [vmem:[%s2245_s28 + $0x200] sm:$0xff]  ;;  %v376_v58 = vld [vmem:[%s2245_s28 + $0x210] sm:$0xff] }
  0x5e   : > { %v683_v13 = vld [vmem:[%s2261_s3 + $0x3a8] sm:$0xff]  ;;  %v390_v14 = vld [vmem:[%s2245_s28 + $0x280] sm:$0xff]  ;;  %v400_v25 = vld [vmem:[%s2245_s28 + $0x2d0] sm:$0xff] }
  0x5f   : > { %1824 = vmatpush1.bf16.msra.mxu0 %v1823_v61  ;;  %v328_v61 = vld [vmem:[%s2245_s28 + $0x90] sm:$0xff]  ;;  %v407_v26 = vld [vmem:[%s2245_s28 + $0x308] sm:$0xff] }
  0x60   : > { %1872 = vmatpush1.bf16.msra.mxu1 %v1871_v62  ;;  %1825 = vmatprep.subr.bf16.mxu0 %v2131_v0  ;;  %v335_v62 = vld [vmem:[%s2245_s28 + $0xc8] sm:$0xff] }
  0x61   : > { %1873 = vmatprep.subr.bf16.mxu1 %v2131_v0 }
  0x63   : > { %1827 = vmatpush1.bf16.msra.mxu0 %v1826_v4  ;;  %v637_v4 = vld [vmem:[%s2261_s3 + $0x238] sm:$0xff] }
  0x64   : > { %1875 = vmatpush1.bf16.msra.mxu1 %v1874_v5  ;;  %1828 = vmatprep.subr.bf16.mxu0 %v2131_v0  ;;  %v668_v5 = vld [vmem:[%s2261_s3 + $0x330] sm:$0xff] }
  0x65   : > { %1876 = vmatprep.subr.bf16.mxu1 %v2131_v0  ;;  %v1949_v12 = vpack.c.bf16 %v669_v6, %v668_v5  ;;  %v384_v5 = vld [vmem:[%s2245_s28 + $0x250] sm:$0xff]  ;;  %v391_v6 = vld [vmem:[%s2245_s28 + $0x288] sm:$0xff] }
  0x67   : > { %1830 = vmatpush1.bf16.msra.mxu0 %v1829_v10  ;;  %v1901_v10 = vpack.c.bf16 %v637_v4, %v636_v3  ;;  %v681_v3 = vld [vmem:[%s2261_s3 + $0x398] sm:$0xff]  ;;  %v382_v4 = vld [vmem:[%s2245_s28 + $0x240] sm:$0xff] }
  0x68   : > { %1878 = vmatpush1.bf16.msra.mxu1 %v1877_v11  ;;  %1831 = vmatprep.subr.bf16.mxu0 %v2131_v0  ;;  %v345_v11 = vld [vmem:[%s2245_s28 + $0x118] sm:$0xff] }
  0x69   : > { %1879 = vmatprep.subr.bf16.mxu1 %v2131_v0 }
  0x6b   : > { %1833 = vmatpush1.bf16.msra.mxu0 %v1832_v16  ;;  %v671_v16 = vld [vmem:[%s2261_s3 + $0x348] sm:$0xff] }
  0x6c   : > { %1881 = vmatpush1.bf16.msra.mxu1 %v1880_v17  ;;  %1834 = vmatprep.subr.bf16.mxu0 %v2131_v0  ;;  %v342_v17 = vld [vmem:[%s2245_s28 + $0x100] sm:$0xff] }
  0x6d   : > { %1882 = vmatprep.subr.bf16.mxu1 %v2131_v0 }
  0x6f   : > { %1836 = vmatpush1.bf16.msra.mxu0 %v1835_v22  ;;  %v1952_v22 = vpack.c.bf16 %v671_v16, %v670_v15  ;;  %v392_v15 = vld [vmem:[%s2245_s28 + $0x290] sm:$0xff]  ;;  %v399_v16 = vld [vmem:[%s2245_s28 + $0x2c8] sm:$0xff] }
  0x70   : > { %1884 = vmatpush1.bf16.msra.mxu1 %v1883_v23  ;;  %1837 = vmatprep.subr.bf16.mxu0 %v2131_v0  ;;  %v640_v23 = vld [vmem:[%s2261_s3 + $0x250] sm:$0xff] }
  0x71   : > { %1885 = vmatprep.subr.bf16.mxu1 %v2131_v0  ;;  %v1907_v30 = vpack.c.bf16 %v641_v24, %v640_v23  ;;  %v685_v23 = vld [vmem:[%s2261_s3 + $0x3b8] sm:$0xff]  ;;  %v398_v24 = vld [vmem:[%s2245_s28 + $0x2c0] sm:$0xff] }
  0x73   : > { %1839 = vmatpush1.bf16.msra.mxu0 %v1838_v28  ;;  %v352_v28 = vld [vmem:[%s2245_s28 + $0x150] sm:$0xff] }
  0x74   : > { %1887 = vmatpush1.bf16.msra.mxu1 %v1886_v29  ;;  %1840 = vmatprep.subr.bf16.mxu0 %v2131_v0  ;;  %v359_v29 = vld [vmem:[%s2245_s28 + $0x188] sm:$0xff] }
  0x75   : > { %1888 = vmatprep.subr.bf16.mxu1 %v2131_v0 }
  0x77   : > { %1842 = vmatpush1.bf16.msra.mxu0 %v1841_v34  ;;  %v643_v34 = vld [vmem:[%s2261_s3 + $0x268] sm:$0xff] }
  0x78   : > { %1890 = vmatpush1.bf16.msra.mxu1 %v1889_v35  ;;  %1891 = vmatprep.subr.bf16.mxu0 %v2131_v0  ;;  %v674_v35 = vld [vmem:[%s2261_s3 + $0x360] sm:$0xff] }
  0x79   : > { %1939 = vmatprep.subr.bf16.mxu1 %v2131_v0 }
  0x7a   : > { %759 = vmatmul.mubr.f32.vlgmr.msra.gmra.mrb[0].mxu0 %v310_v40  ;;  %v1910_v40 = vpack.c.bf16 %v643_v34, %v642_v33  ;;  %v687_v33 = vld [vmem:[%s2261_s3 + $0x3c8] sm:$0xff]  ;;  %v406_v34 = vld [vmem:[%s2245_s28 + $0x300] sm:$0xff] }
  0x7b   : > { %984 = vmatmul.mubr.f32.vlgmr.msra.gmra.mrb[0].mxu1 %v312_v42  ;;  %1893 = vmatpush1.bf16.msra.mxu0 %v1892_v41  ;;  %v369_v41 = vld [vmem:[%s2245_s28 + $0x1d8] sm:$0xff]  ;;  %v1958_v42 = vpack.c.bf16 %v675_v36, %v674_v35  ;;  %v408_v35 = vld [vmem:[%s2245_s28 + $0x310] sm:$0xff]  ;;  %v415_v36 = vld [vmem:[%s2245_s28 + $0x348] sm:$0xff] }
  0x7c   : > { %763 = vmatprep.mubr.f32.mxu0 %v319_v44  ;;  %1941 = vmatpush1.bf16.msra.mxu1 %v1940_v43  ;;  %v644_v43 = vld [vmem:[%s2261_s3 + $0x270] sm:$0xff]  ;;  %v645_v44 = vld [vmem:[%s2261_s3 + $0x278] sm:$0xff] }
  0x7d   : > { %988 = vmatprep.mubr.f32.mxu1 %v321_v47  ;;  %1894 = vmatprep.subr.bf16.mxu0 %v2131_v0  ;;  %v366_v47 = vld [vmem:[%s2245_s28 + $0x1c0] sm:$0xff] }
  0x7e   : > { %764 = vmatmul.mubr.f32.gmra.mrb[2].mxu0 %v318_v50  ;;  %1942 = vmatprep.subr.bf16.mxu1 %v2131_v0  ;;  %v1913_v50 = vpack.c.bf16 %v645_v44, %v644_v43  ;;  %v689_v43 = vld [vmem:[%s2261_s3 + $0x3d8] sm:$0xff]  ;;  %v414_v44 = vld [vmem:[%s2245_s28 + $0x340] sm:$0xff] }
  0x7f   : > { %989 = vmatmul.mubr.f32.gmra.mrb[2].mxu1 %v320_v51  ;;  %768 = vmatprep.mubr.f32.mxu0 %v327_v52  ;;  %v377_v51 = vld [vmem:[%s2245_s28 + $0x218] sm:$0xff]  ;;  %v1961_v52 = vpack.c.bf16 %v677_v46, %v676_v45  ;;  %v416_v45 = vld [vmem:[%s2245_s28 + $0x350] sm:$0xff]  ;;  %v423_v46 = vld [vmem:[%s2245_s28 + $0x388] sm:$0xff] }
  0x80   : > { %993 = vmatprep.mubr.f32.mxu1 %v329_v54  ;;  %1896 = vmatpush1.bf16.msra.mxu0 %v1895_v53  ;;  %v646_v53 = vld [vmem:[%s2261_s3 + $0x280] sm:$0xff]  ;;  %v647_v54 = vld [vmem:[%s2261_s3 + $0x288] sm:$0xff] }
  0x81   : > { %1944 = vmatpush1.bf16.msra.mxu1 %v1943_v55  ;;  %1897 = vmatprep.subr.bf16.mxu0 %v2131_v0  ;;  %v678_v55 = vld [vmem:[%s2261_s3 + $0x380] sm:$0xff] }
  0x82   : > { %769 = vmatmul.mubr.f32.gmra.mrb[4].mxu0 %v326_v60  ;;  %1945 = vmatprep.subr.bf16.mxu1 %v2131_v0  ;;  %v1916_v60 = vpack.c.bf16 %v647_v54, %v646_v53  ;;  %v691_v53 = vld [vmem:[%s2261_s3 + $0x3e8] sm:$0xff]  ;;  %v422_v54 = vld [vmem:[%s2245_s28 + $0x380] sm:$0xff] }
  0x83   : > { %994 = vmatmul.mubr.f32.gmra.mrb[4].mxu1 %v328_v61  ;;  %773 = vmatprep.mubr.f32.mxu0 %v335_v62  ;;  %v385_v61 = vld [vmem:[%s2245_s28 + $0x258] sm:$0xff]  ;;  %v1964_v62 = vpack.c.bf16 %v679_v56, %v678_v55  ;;  %v424_v55 = vld [vmem:[%s2245_s28 + $0x390] sm:$0xff]  ;;  %v431_v56 = vld [vmem:[%s2245_s28 + $0x3c8] sm:$0xff] }
  0x84   : > { %998 = vmatprep.mubr.f32.mxu1 %v337_v1  ;;  %1899 = vmatpush1.bf16.msra.mxu0 %v1898_v63  ;;  %v648_v63 = vld [vmem:[%s2261_s3 + $0x290] sm:$0xff]  ;;  %v649_v1 = vld [vmem:[%s2261_s3 + $0x298] sm:$0xff] }
  0x85   : > { %1947 = vmatpush1.bf16.msra.mxu1 %v1946_v2  ;;  %1900 = vmatprep.subr.bf16.mxu0 %v2131_v0  ;;  %v680_v2 = vld [vmem:[%s2261_s3 + $0x390] sm:$0xff] }
  0x86   : > { %774 = vmatmul.mubr.f32.gmra.mrb[6].mxu0 %v334_v7  ;;  %1948 = vmatprep.subr.bf16.mxu1 %v2131_v0  ;;  %v1919_v7 = vpack.c.bf16 %v649_v1, %v648_v63  ;;  %v693_v63 = vld [vmem:[%s2261_s3 + $0x3f8] sm:$0xff]  ;;  %v430_v1 = vld [vmem:[%s2245_s28 + $0x3c0] sm:$0xff] }
  0x87   : > { %999 = vmatmul.mubr.f32.gmra.mrb[6].mxu1 %v336_v8  ;;  %778 = vmatprep.mubr.f32.mxu0 %v343_v9  ;;  %v393_v8 = vld [vmem:[%s2245_s28 + $0x298] sm:$0xff]  ;;  %v1967_v9 = vpack.c.bf16 %v681_v3, %v680_v2  ;;  %v432_v2 = vld [vmem:[%s2245_s28 + $0x3d0] sm:$0xff]  ;;  %v439_v3 = vld [vmem:[%s2245_s28 + $0x408] sm:$0xff] }
  0x88   : > { %1003 = vmatprep.mubr.f32.mxu1 %v345_v11  ;;  %1902 = vmatpush1.bf16.msra.mxu0 %v1901_v10  ;;  %v650_v10 = vld [vmem:[%s2261_s3 + $0x2a0] sm:$0xff]  ;;  %v651_v11 = vld [vmem:[%s2261_s3 + $0x2a8] sm:$0xff] }
  0x89   : > { %1950 = vmatpush1.bf16.msra.mxu1 %v1949_v12  ;;  %1903 = vmatprep.subr.bf16.mxu0 %v2131_v0  ;;  %v682_v12 = vld [vmem:[%s2261_s3 + $0x3a0] sm:$0xff] }
  0x8a   : > { %779 = vmatmul.mubr.f32.gmra.mrb[8].mxu0 %v342_v17  ;;  %1951 = vmatprep.subr.bf16.mxu1 %v2131_v0  ;;  %v1922_v17 = vpack.c.bf16 %v651_v11, %v650_v10  ;;  %v449_v10 = vld [vmem:[%s2245_s28 + $0x458] sm:$0xff]  ;;  %v446_v11 = vld [vmem:[%s2245_s28 + $0x440] sm:$0xff] }
  0x8b   : > { %1004 = vmatmul.mubr.f32.gmra.mrb[8].mxu1 %v344_v18  ;;  %783 = vmatprep.mubr.f32.mxu0 %v351_v19  ;;  %v401_v18 = vld [vmem:[%s2245_s28 + $0x2d8] sm:$0xff]  ;;  %v1970_v19 = vpack.c.bf16 %v683_v13, %v682_v12  ;;  %v455_v12 = vld [vmem:[%s2245_s28 + $0x488] sm:$0xff] }
  0x8c   : > { %1008 = vmatprep.mubr.f32.mxu1 %v353_v21  ;;  %1905 = vmatpush1.bf16.msra.mxu0 %v1904_v20  ;;  %v652_v20 = vld [vmem:[%s2261_s3 + $0x2b0] sm:$0xff]  ;;  %v653_v21 = vld [vmem:[%s2261_s3 + $0x2b8] sm:$0xff] }
  0x8d   : > { %1953 = vmatpush1.bf16.msra.mxu1 %v1952_v22  ;;  %1906 = vmatprep.subr.bf16.mxu0 %v2131_v0  ;;  %v684_v22 = vld [vmem:[%s2261_s3 + $0x3b0] sm:$0xff]  ;;  %v457_v13 = vld [vmem:[%s2245_s28 + $0x498] sm:$0xff] }
  0x8e   : > { %784 = vmatmul.mubr.f32.gmra.mrb[10].mxu0 %v350_v27  ;;  %1954 = vmatprep.subr.bf16.mxu1 %v2131_v0  ;;  %v1925_v27 = vpack.c.bf16 %v653_v21, %v652_v20  ;;  %v471_v20 = vld [vmem:[%s2245_s28 + $0x508] sm:$0xff]  ;;  %v473_v21 = vld [vmem:[%s2245_s28 + $0x518] sm:$0xff] }
  0x8f   : > { %1009 = vmatmul.mubr.f32.gmra.mrb[10].mxu1 %v352_v28  ;;  %788 = vmatprep.mubr.f32.mxu0 %v359_v29  ;;  %v409_v28 = vld [vmem:[%s2245_s28 + $0x318] sm:$0xff]  ;;  %v1973_v29 = vpack.c.bf16 %v685_v23, %v684_v22  ;;  %v470_v22 = vld [vmem:[%s2245_s28 + $0x500] sm:$0xff]  ;;  %v472_v23 = vld [vmem:[%s2245_s28 + $0x510] sm:$0xff] }
  0x90   : > { %1013 = vmatprep.mubr.f32.mxu1 %v361_v31  ;;  %1908 = vmatpush1.bf16.msra.mxu0 %v1907_v30  ;;  %v654_v30 = vld [vmem:[%s2261_s3 + $0x2c0] sm:$0xff]  ;;  %v655_v31 = vld [vmem:[%s2261_s3 + $0x2c8] sm:$0xff] }
  0x91   : > { %1956 = vmatpush1.bf16.msra.mxu1 %v1955_v32  ;;  %1909 = vmatprep.subr.bf16.mxu0 %v2131_v0  ;;  %v686_v32 = vld [vmem:[%s2261_s3 + $0x3c0] sm:$0xff] }
  0x92   : > { %789 = vmatmul.mubr.f32.gmra.mrb[12].mxu0 %v358_v37  ;;  %1957 = vmatprep.subr.bf16.mxu1 %v2131_v0  ;;  %v1928_v37 = vpack.c.bf16 %v655_v31, %v654_v30  ;;  %v486_v30 = vld [vmem:[%s2245_s28 + $0x580] sm:$0xff]  ;;  %v488_v31 = vld [vmem:[%s2245_s28 + $0x590] sm:$0xff] }
  0x93   : > { %1014 = vmatmul.mubr.f32.gmra.mrb[12].mxu1 %v360_v38  ;;  %793 = vmatprep.mubr.f32.mxu0 %v367_v39  ;;  %v417_v38 = vld [vmem:[%s2245_s28 + $0x358] sm:$0xff]  ;;  %v1976_v39 = vpack.c.bf16 %v687_v33, %v686_v32  ;;  %v495_v32 = vld [vmem:[%s2245_s28 + $0x5c8] sm:$0xff] }
  0x94   : > { %1018 = vmatprep.mubr.f32.mxu1 %v369_v41  ;;  %1911 = vmatpush1.bf16.msra.mxu0 %v1910_v40  ;;  %v656_v40 = vld [vmem:[%s2261_s3 + $0x2d0] sm:$0xff]  ;;  %v657_v41 = vld [vmem:[%s2261_s3 + $0x2d8] sm:$0xff] }
  0x95   : > { %1959 = vmatpush1.bf16.msra.mxu1 %v1958_v42  ;;  %1912 = vmatprep.subr.bf16.mxu0 %v2131_v0  ;;  %v688_v42 = vld [vmem:[%s2261_s3 + $0x3d0] sm:$0xff]  ;;  %v497_v33 = vld [vmem:[%s2245_s28 + $0x5d8] sm:$0xff] }
  0x96   : > { %794 = vmatmul.mubr.f32.gmra.mrb[14].mxu0 %v366_v47  ;;  %1960 = vmatprep.subr.bf16.mxu1 %v2131_v0  ;;  %v1931_v47 = vpack.c.bf16 %v657_v41, %v656_v40  ;;  %v511_v40 = vld [vmem:[%s2245_s28 + $0x648] sm:$0xff]  ;;  %v513_v41 = vld [vmem:[%s2245_s28 + $0x658] sm:$0xff] }
  0x97   : > { %1019 = vmatmul.mubr.f32.gmra.mrb[14].mxu1 %v368_v48  ;;  %798 = vmatprep.mubr.f32.mxu0 %v375_v49  ;;  %v425_v48 = vld [vmem:[%s2245_s28 + $0x398] sm:$0xff]  ;;  %v1979_v49 = vpack.c.bf16 %v689_v43, %v688_v42  ;;  %v510_v42 = vld [vmem:[%s2245_s28 + $0x640] sm:$0xff]  ;;  %v512_v43 = vld [vmem:[%s2245_s28 + $0x650] sm:$0xff] }
  0x98   : > { %1023 = vmatprep.mubr.f32.mxu1 %v377_v51  ;;  %1914 = vmatpush1.bf16.msra.mxu0 %v1913_v50  ;;  %v658_v50 = vld [vmem:[%s2261_s3 + $0x2e0] sm:$0xff]  ;;  %v659_v51 = vld [vmem:[%s2261_s3 + $0x2e8] sm:$0xff] }
  0x99   : > { %1962 = vmatpush1.bf16.msra.mxu1 %v1961_v52  ;;  %1915 = vmatprep.subr.bf16.mxu0 %v2131_v0  ;;  %v690_v52 = vld [vmem:[%s2261_s3 + $0x3e0] sm:$0xff] }
  0x9a   : > { %799 = vmatmul.mubr.f32.gmra.mrb[16].mxu0 %v374_v57  ;;  %1963 = vmatprep.subr.bf16.mxu1 %v2131_v0  ;;  %v1934_v57 = vpack.c.bf16 %v659_v51, %v658_v50  ;;  %v526_v50 = vld [vmem:[%s2245_s28 + $0x6c0] sm:$0xff]  ;;  %v528_v51 = vld [vmem:[%s2245_s28 + $0x6d0] sm:$0xff] }
  0x9b   : > { %1024 = vmatmul.mubr.f32.gmra.mrb[16].mxu1 %v376_v58  ;;  %803 = vmatprep.mubr.f32.mxu0 %v383_v59  ;;  %v433_v58 = vld [vmem:[%s2245_s28 + $0x3d8] sm:$0xff]  ;;  %v1982_v59 = vpack.c.bf16 %v691_v53, %v690_v52  ;;  %v535_v52 = vld [vmem:[%s2245_s28 + $0x708] sm:$0xff] }
  0x9c   : > { %1028 = vmatprep.mubr.f32.mxu1 %v385_v61  ;;  %1917 = vmatpush1.bf16.msra.mxu0 %v1916_v60  ;;  %v660_v60 = vld [vmem:[%s2261_s3 + $0x2f0] sm:$0xff]  ;;  %v661_v61 = vld [vmem:[%s2261_s3 + $0x2f8] sm:$0xff] }
  0x9d   : > { %1965 = vmatpush1.bf16.msra.mxu1 %v1964_v62  ;;  %1918 = vmatprep.subr.bf16.mxu0 %v2131_v0  ;;  %v692_v62 = vld [vmem:[%s2261_s3 + $0x3f0] sm:$0xff]  ;;  %v537_v53 = vld [vmem:[%s2245_s28 + $0x718] sm:$0xff] }
  0x9e   : > { %804 = vmatmul.mubr.f32.gmra.mrb[18].mxu0 %v382_v4  ;;  %1966 = vmatprep.subr.bf16.mxu1 %v2131_v0  ;;  %v1937_v4 = vpack.c.bf16 %v661_v61, %v660_v60  ;;  %v551_v60 = vld [vmem:[%s2245_s28 + $0x788] sm:$0xff]  ;;  %v553_v61 = vld [vmem:[%s2245_s28 + $0x798] sm:$0xff] }
  0x9f   : > { %1029 = vmatmul.mubr.f32.gmra.mrb[18].mxu1 %v384_v5  ;;  %808 = vmatprep.mubr.f32.mxu0 %v391_v6  ;;  %v441_v5 = vld [vmem:[%s2245_s28 + $0x418] sm:$0xff]  ;;  %v1985_v6 = vpack.c.bf16 %v693_v63, %v692_v62  ;;  %v550_v62 = vld [vmem:[%s2245_s28 + $0x780] sm:$0xff]  ;;  %v552_v63 = vld [vmem:[%s2245_s28 + $0x790] sm:$0xff] }
  0xa0   : > { %1033 = vmatprep.mubr.f32.mxu1 %v393_v8  ;;  %1920 = vmatpush1.bf16.msra.mxu0 %v1919_v7  ;;  %v438_v7 = vld [vmem:[%s2245_s28 + $0x400] sm:$0xff]  ;;  %v440_v8 = vld [vmem:[%s2245_s28 + $0x410] sm:$0xff] }
  0xa1   : > { %1968 = vmatpush1.bf16.msra.mxu1 %v1967_v9  ;;  %1921 = vmatprep.subr.bf16.mxu0 %v2131_v0  ;;  %v447_v9 = vld [vmem:[%s2245_s28 + $0x448] sm:$0xff] }
  0xa2   : > { %809 = vmatmul.mubr.f32.gmra.mrb[20].mxu0 %v390_v14  ;;  %1969 = vmatprep.subr.bf16.mxu1 %v2131_v0  ;;  %v454_v14 = vld [vmem:[%s2245_s28 + $0x480] sm:$0xff] }
  0xa3   : > { %1034 = vmatmul.mubr.f32.gmra.mrb[20].mxu1 %v392_v15  ;;  %813 = vmatprep.mubr.f32.mxu0 %v399_v16  ;;  %v456_v15 = vld [vmem:[%s2245_s28 + $0x490] sm:$0xff]  ;;  %v463_v16 = vld [vmem:[%s2245_s28 + $0x4c8] sm:$0xff] }
  0xa4   : > { %1038 = vmatprep.mubr.f32.mxu1 %v401_v18  ;;  %1923 = vmatpush1.bf16.msra.mxu0 %v1922_v17  ;;  %v465_v17 = vld [vmem:[%s2245_s28 + $0x4d8] sm:$0xff]  ;;  %v462_v18 = vld [vmem:[%s2245_s28 + $0x4c0] sm:$0xff] }
  0xa5   : > { %1971 = vmatpush1.bf16.msra.mxu1 %v1970_v19  ;;  %1924 = vmatprep.subr.bf16.mxu0 %v2131_v0  ;;  %v464_v19 = vld [vmem:[%s2245_s28 + $0x4d0] sm:$0xff] }
  0xa6   : > { %814 = vmatmul.mubr.f32.gmra.mrb[22].mxu0 %v398_v24  ;;  %1972 = vmatprep.subr.bf16.mxu1 %v2131_v0  ;;  %v479_v24 = vld [vmem:[%s2245_s28 + $0x548] sm:$0xff] }
  0xa7   : > { %1039 = vmatmul.mubr.f32.gmra.mrb[22].mxu1 %v400_v25  ;;  %818 = vmatprep.mubr.f32.mxu0 %v407_v26  ;;  %v481_v25 = vld [vmem:[%s2245_s28 + $0x558] sm:$0xff]  ;;  %v478_v26 = vld [vmem:[%s2245_s28 + $0x540] sm:$0xff] }
  0xa8   : > { %1043 = vmatprep.mubr.f32.mxu1 %v409_v28  ;;  %1926 = vmatpush1.bf16.msra.mxu0 %v1925_v27  ;;  %v480_v27 = vld [vmem:[%s2245_s28 + $0x550] sm:$0xff]  ;;  %v487_v28 = vld [vmem:[%s2245_s28 + $0x588] sm:$0xff] }
  0xa9   : > { %1974 = vmatpush1.bf16.msra.mxu1 %v1973_v29  ;;  %1927 = vmatprep.subr.bf16.mxu0 %v2131_v0  ;;  %v489_v29 = vld [vmem:[%s2245_s28 + $0x598] sm:$0xff] }
  0xaa   : > { %819 = vmatmul.mubr.f32.gmra.mrb[24].mxu0 %v406_v34  ;;  %1975 = vmatprep.subr.bf16.mxu1 %v2131_v0  ;;  %v494_v34 = vld [vmem:[%s2245_s28 + $0x5c0] sm:$0xff] }
  0xab   : > { %1044 = vmatmul.mubr.f32.gmra.mrb[24].mxu1 %v408_v35  ;;  %823 = vmatprep.mubr.f32.mxu0 %v415_v36  ;;  %v496_v35 = vld [vmem:[%s2245_s28 + $0x5d0] sm:$0xff]  ;;  %v503_v36 = vld [vmem:[%s2245_s28 + $0x608] sm:$0xff] }
  0xac   : > { %1048 = vmatprep.mubr.f32.mxu1 %v417_v38  ;;  %1929 = vmatpush1.bf16.msra.mxu0 %v1928_v37  ;;  %v505_v37 = vld [vmem:[%s2245_s28 + $0x618] sm:$0xff]  ;;  %v502_v38 = vld [vmem:[%s2245_s28 + $0x600] sm:$0xff] }
  0xad   : > { %1977 = vmatpush1.bf16.msra.mxu1 %v1976_v39  ;;  %1930 = vmatprep.subr.bf16.mxu0 %v2131_v0  ;;  %v504_v39 = vld [vmem:[%s2245_s28 + $0x610] sm:$0xff] }
  0xae   : > { %824 = vmatmul.mubr.f32.gmra.mrb[26].mxu0 %v414_v44  ;;  %1978 = vmatprep.subr.bf16.mxu1 %v2131_v0  ;;  %v519_v44 = vld [vmem:[%s2245_s28 + $0x688] sm:$0xff] }
  0xaf   : > { %1049 = vmatmul.mubr.f32.gmra.mrb[26].mxu1 %v416_v45  ;;  %828 = vmatprep.mubr.f32.mxu0 %v423_v46  ;;  %v521_v45 = vld [vmem:[%s2245_s28 + $0x698] sm:$0xff]  ;;  %v518_v46 = vld [vmem:[%s2245_s28 + $0x680] sm:$0xff] }
  0xb0   : > { %1053 = vmatprep.mubr.f32.mxu1 %v425_v48  ;;  %1932 = vmatpush1.bf16.msra.mxu0 %v1931_v47  ;;  %v520_v47 = vld [vmem:[%s2245_s28 + $0x690] sm:$0xff]  ;;  %v527_v48 = vld [vmem:[%s2245_s28 + $0x6c8] sm:$0xff] }
  0xb1   : > { %1980 = vmatpush1.bf16.msra.mxu1 %v1979_v49  ;;  %1933 = vmatprep.subr.bf16.mxu0 %v2131_v0  ;;  %v529_v49 = vld [vmem:[%s2245_s28 + $0x6d8] sm:$0xff] }
  0xb2   : > { %829 = vmatmul.mubr.f32.gmra.mrb[28].mxu0 %v422_v54  ;;  %1981 = vmatprep.subr.bf16.mxu1 %v2131_v0  ;;  %v534_v54 = vld [vmem:[%s2245_s28 + $0x700] sm:$0xff] }
  0xb3   : > { %1054 = vmatmul.mubr.f32.gmra.mrb[28].mxu1 %v424_v55  ;;  %833 = vmatprep.mubr.f32.mxu0 %v431_v56  ;;  %v536_v55 = vld [vmem:[%s2245_s28 + $0x710] sm:$0xff]  ;;  %v543_v56 = vld [vmem:[%s2245_s28 + $0x748] sm:$0xff] }
  0xb4   : > { %1058 = vmatprep.mubr.f32.mxu1 %v433_v58  ;;  %1935 = vmatpush1.bf16.msra.mxu0 %v1934_v57  ;;  %v545_v57 = vld [vmem:[%s2245_s28 + $0x758] sm:$0xff]  ;;  %v542_v58 = vld [vmem:[%s2245_s28 + $0x740] sm:$0xff] }
  0xb5   : > { %1983 = vmatpush1.bf16.msra.mxu1 %v1982_v59  ;;  %1936 = vmatprep.subr.bf16.mxu0 %v2131_v0  ;;  %v544_v59 = vld [vmem:[%s2245_s28 + $0x750] sm:$0xff] }
  0xb6   : > { %834 = vmatmul.mubr.f32.gmra.mrb[30].mxu0 %v430_v1  ;;  %1984 = vmatprep.subr.bf16.mxu1 %v2131_v0  ;;  %v448_v0 = vld [vmem:[%s2245_s28 + $0x450] sm:$0xff]  ;;  %v559_v1 = vld [vmem:[%s2245_s28 + $0x7c8] sm:$0xff] }
  0xb7   : > { %1059 = vmatmul.mubr.f32.gmra.mrb[30].mxu1 %v432_v2  ;;  %838 = vmatprep.mubr.f32.mxu0 %v439_v3  ;;  %v561_v2 = vld [vmem:[%s2245_s28 + $0x7d8] sm:$0xff]  ;;  %v558_v3 = vld [vmem:[%s2245_s28 + $0x7c0] sm:$0xff] }
  0xb8   : > { %1063 = vmatprep.mubr.f32.mxu1 %v441_v5  ;;  %1938 = vmatpush1.bf16.msra.mxu0 %v1937_v4  ;;  %v560_v4 = vld [vmem:[%s2245_s28 + $0x7d0] sm:$0xff]  ;;  %v315_v5 = vld [vmem:[%s2245_s28 + $0x28] sm:$0xff] }
  0xb9   : > { %1986 = vmatpush1.bf16.msra.mxu1 %v1985_v6  ;;  %v317_v6 = vld [vmem:[%s2245_s28 + $0x38] sm:$0xff] }
  0xba   : > { %839 = vmatmul.mubr.f32.gmra.mrb[32].mxu0 %v438_v7  ;;  %v314_v7 = vld [vmem:[%s2245_s28 + $0x20] sm:$0xff] }
  0xbb   : > { %1064 = vmatmul.mubr.f32.gmra.mrb[32].mxu1 %v440_v8  ;;  %843 = vmatprep.mubr.f32.mxu0 %v447_v9  ;;  %v316_v8 = vld [vmem:[%s2245_s28 + $0x30] sm:$0xff]  ;;  %v323_v9 = vld [vmem:[%s2245_s28 + $0x68] sm:$0xff] }
  0xbc   : > { %1068 = vmatprep.mubr.f32.mxu1 %v449_v10  ;;  %v325_v10 = vld [vmem:[%s2245_s28 + $0x78] sm:$0xff] }
  0xbe   : > { %844 = vmatmul.mubr.f32.gmra.mrb[34].mxu0 %v446_v11  ;;  %v322_v11 = vld [vmem:[%s2245_s28 + $0x60] sm:$0xff] }
  0xbf   : > { %1069 = vmatmul.mubr.f32.gmra.mrb[34].mxu1 %v448_v0  ;;  %848 = vmatprep.mubr.f32.mxu0 %v455_v12  ;;  %v324_v0 = vld [vmem:[%s2245_s28 + $0x70] sm:$0xff]  ;;  %v331_v12 = vld [vmem:[%s2245_s28 + $0xa8] sm:$0xff] }
  0xc0   : > { %1073 = vmatprep.mubr.f32.mxu1 %v457_v13  ;;  %v333_v13 = vld [vmem:[%s2245_s28 + $0xb8] sm:$0xff] }
  0xc2   : > { %849 = vmatmul.mubr.f32.gmra.mrb[36].mxu0 %v454_v14  ;;  %v330_v14 = vld [vmem:[%s2245_s28 + $0xa0] sm:$0xff] }
  0xc3   : > { %1074 = vmatmul.mubr.f32.gmra.mrb[36].mxu1 %v456_v15  ;;  %853 = vmatprep.mubr.f32.mxu0 %v463_v16  ;;  %v332_v15 = vld [vmem:[%s2245_s28 + $0xb0] sm:$0xff]  ;;  %v339_v16 = vld [vmem:[%s2245_s28 + $0xe8] sm:$0xff] }
  0xc4   : > { %1078 = vmatprep.mubr.f32.mxu1 %v465_v17  ;;  %v341_v17 = vld [vmem:[%s2245_s28 + $0xf8] sm:$0xff] }
  0xc6   : > { %854 = vmatmul.mubr.f32.gmra.mrb[38].mxu0 %v462_v18  ;;  %v338_v18 = vld [vmem:[%s2245_s28 + $0xe0] sm:$0xff] }
  0xc7   : > { %1079 = vmatmul.mubr.f32.gmra.mrb[38].mxu1 %v464_v19  ;;  %858 = vmatprep.mubr.f32.mxu0 %v471_v20  ;;  %v340_v19 = vld [vmem:[%s2245_s28 + $0xf0] sm:$0xff]  ;;  %v347_v20 = vld [vmem:[%s2245_s28 + $0x128] sm:$0xff] }
  0xc8   : > { %1083 = vmatprep.mubr.f32.mxu1 %v473_v21  ;;  %v349_v21 = vld [vmem:[%s2245_s28 + $0x138] sm:$0xff] }
  0xca   : > { %859 = vmatmul.mubr.f32.gmra.mrb[40].mxu0 %v470_v22  ;;  %v346_v22 = vld [vmem:[%s2245_s28 + $0x120] sm:$0xff] }
  0xcb   : > { %1084 = vmatmul.mubr.f32.gmra.mrb[40].mxu1 %v472_v23  ;;  %863 = vmatprep.mubr.f32.mxu0 %v479_v24  ;;  %v348_v23 = vld [vmem:[%s2245_s28 + $0x130] sm:$0xff]  ;;  %v355_v24 = vld [vmem:[%s2245_s28 + $0x168] sm:$0xff] }
  0xcc   : > { %1088 = vmatprep.mubr.f32.mxu1 %v481_v25  ;;  %v357_v25 = vld [vmem:[%s2245_s28 + $0x178] sm:$0xff] }
  0xce   : > { %864 = vmatmul.mubr.f32.gmra.mrb[42].mxu0 %v478_v26  ;;  %v354_v26 = vld [vmem:[%s2245_s28 + $0x160] sm:$0xff] }
  0xcf   : > { %1089 = vmatmul.mubr.f32.gmra.mrb[42].mxu1 %v480_v27  ;;  %868 = vmatprep.mubr.f32.mxu0 %v487_v28  ;;  %v356_v27 = vld [vmem:[%s2245_s28 + $0x170] sm:$0xff]  ;;  %v363_v28 = vld [vmem:[%s2245_s28 + $0x1a8] sm:$0xff] }
  0xd0   : > { %1093 = vmatprep.mubr.f32.mxu1 %v489_v29  ;;  %v365_v29 = vld [vmem:[%s2245_s28 + $0x1b8] sm:$0xff] }
  0xd2   : > { %869 = vmatmul.mubr.f32.gmra.mrb[44].mxu0 %v486_v30  ;;  %v362_v30 = vld [vmem:[%s2245_s28 + $0x1a0] sm:$0xff] }
  0xd3   : > { %1094 = vmatmul.mubr.f32.gmra.mrb[44].mxu1 %v488_v31  ;;  %873 = vmatprep.mubr.f32.mxu0 %v495_v32  ;;  %v364_v31 = vld [vmem:[%s2245_s28 + $0x1b0] sm:$0xff]  ;;  %v371_v32 = vld [vmem:[%s2245_s28 + $0x1e8] sm:$0xff] }
  0xd4   : > { %1098 = vmatprep.mubr.f32.mxu1 %v497_v33  ;;  %v373_v33 = vld [vmem:[%s2245_s28 + $0x1f8] sm:$0xff] }
  0xd6   : > { %874 = vmatmul.mubr.f32.gmra.mrb[46].mxu0 %v494_v34  ;;  %v370_v34 = vld [vmem:[%s2245_s28 + $0x1e0] sm:$0xff] }
  0xd7   : > { %1099 = vmatmul.mubr.f32.gmra.mrb[46].mxu1 %v496_v35  ;;  %878 = vmatprep.mubr.f32.mxu0 %v503_v36  ;;  %v372_v35 = vld [vmem:[%s2245_s28 + $0x1f0] sm:$0xff]  ;;  %v379_v36 = vld [vmem:[%s2245_s28 + $0x228] sm:$0xff] }
  0xd8   : > { %1103 = vmatprep.mubr.f32.mxu1 %v505_v37  ;;  %v381_v37 = vld [vmem:[%s2245_s28 + $0x238] sm:$0xff] }
  0xda   : > { %879 = vmatmul.mubr.f32.gmra.mrb[48].mxu0 %v502_v38  ;;  %v378_v38 = vld [vmem:[%s2245_s28 + $0x220] sm:$0xff] }
  0xdb   : > { %1104 = vmatmul.mubr.f32.gmra.mrb[48].mxu1 %v504_v39  ;;  %883 = vmatprep.mubr.f32.mxu0 %v511_v40  ;;  %v380_v39 = vld [vmem:[%s2245_s28 + $0x230] sm:$0xff]  ;;  %v387_v40 = vld [vmem:[%s2245_s28 + $0x268] sm:$0xff] }
  0xdc   : > { %1108 = vmatprep.mubr.f32.mxu1 %v513_v41  ;;  %v389_v41 = vld [vmem:[%s2245_s28 + $0x278] sm:$0xff] }
  0xde   : > { %884 = vmatmul.mubr.f32.gmra.mrb[50].mxu0 %v510_v42  ;;  %v386_v42 = vld [vmem:[%s2245_s28 + $0x260] sm:$0xff] }
  0xdf   : > { %1109 = vmatmul.mubr.f32.gmra.mrb[50].mxu1 %v512_v43  ;;  %888 = vmatprep.mubr.f32.mxu0 %v519_v44  ;;  %v388_v43 = vld [vmem:[%s2245_s28 + $0x270] sm:$0xff]  ;;  %v395_v44 = vld [vmem:[%s2245_s28 + $0x2a8] sm:$0xff] }
  0xe0   : > { %1113 = vmatprep.mubr.f32.mxu1 %v521_v45  ;;  %v397_v45 = vld [vmem:[%s2245_s28 + $0x2b8] sm:$0xff] }
  0xe2   : > { %889 = vmatmul.mubr.f32.gmra.mrb[52].mxu0 %v518_v46  ;;  %v394_v46 = vld [vmem:[%s2245_s28 + $0x2a0] sm:$0xff] }
  0xe3   : > { %1114 = vmatmul.mubr.f32.gmra.mrb[52].mxu1 %v520_v47  ;;  %893 = vmatprep.mubr.f32.mxu0 %v527_v48  ;;  %v396_v47 = vld [vmem:[%s2245_s28 + $0x2b0] sm:$0xff]  ;;  %v403_v48 = vld [vmem:[%s2245_s28 + $0x2e8] sm:$0xff] }
  0xe4   : > { %1118 = vmatprep.mubr.f32.mxu1 %v529_v49  ;;  %v405_v49 = vld [vmem:[%s2245_s28 + $0x2f8] sm:$0xff] }
  0xe6   : > { %894 = vmatmul.mubr.f32.gmra.mrb[54].mxu0 %v526_v50  ;;  %v402_v50 = vld [vmem:[%s2245_s28 + $0x2e0] sm:$0xff] }
  0xe7   : > { %1119 = vmatmul.mubr.f32.gmra.mrb[54].mxu1 %v528_v51  ;;  %898 = vmatprep.mubr.f32.mxu0 %v535_v52  ;;  %v404_v51 = vld [vmem:[%s2245_s28 + $0x2f0] sm:$0xff]  ;;  %v411_v52 = vld [vmem:[%s2245_s28 + $0x328] sm:$0xff] }
  0xe8   : > { %1123 = vmatprep.mubr.f32.mxu1 %v537_v53  ;;  %v413_v53 = vld [vmem:[%s2245_s28 + $0x338] sm:$0xff] }
  0xea   : > { %899 = vmatmul.mubr.f32.gmra.mrb[56].mxu0 %v534_v54  ;;  %v410_v54 = vld [vmem:[%s2245_s28 + $0x320] sm:$0xff] }
  0xeb   : > { %1124 = vmatmul.mubr.f32.gmra.mrb[56].mxu1 %v536_v55  ;;  %903 = vmatprep.mubr.f32.mxu0 %v543_v56  ;;  %v412_v55 = vld [vmem:[%s2245_s28 + $0x330] sm:$0xff]  ;;  %v419_v56 = vld [vmem:[%s2245_s28 + $0x368] sm:$0xff] }
  0xec   : > { %1128 = vmatprep.mubr.f32.mxu1 %v545_v57  ;;  %v421_v57 = vld [vmem:[%s2245_s28 + $0x378] sm:$0xff] }
  0xee   : > { %904 = vmatmul.mubr.f32.gmra.mrb[58].mxu0 %v542_v58  ;;  %v418_v58 = vld [vmem:[%s2245_s28 + $0x360] sm:$0xff] }
  0xef   : > { %1129 = vmatmul.mubr.f32.gmra.mrb[58].mxu1 %v544_v59  ;;  %908 = vmatprep.mubr.f32.mxu0 %v551_v60  ;;  %v420_v59 = vld [vmem:[%s2245_s28 + $0x370] sm:$0xff]  ;;  %v427_v60 = vld [vmem:[%s2245_s28 + $0x3a8] sm:$0xff] }
  0xf0   : > { %1133 = vmatprep.mubr.f32.mxu1 %v553_v61  ;;  %v429_v61 = vld [vmem:[%s2245_s28 + $0x3b8] sm:$0xff] }
  0xf2   : > { %909 = vmatmul.mubr.f32.gmra.mrb[60].mxu0 %v550_v62  ;;  %v426_v62 = vld [vmem:[%s2245_s28 + $0x3a0] sm:$0xff] }
  0xf3   : > { %1134 = vmatmul.mubr.f32.gmra.mrb[60].mxu1 %v552_v63  ;;  %913 = vmatprep.mubr.f32.mxu0 %v559_v1  ;;  %v428_v63 = vld [vmem:[%s2245_s28 + $0x3b0] sm:$0xff]  ;;  %v435_v1 = vld [vmem:[%s2245_s28 + $0x3e8] sm:$0xff] }
  0xf4   : > { %1138 = vmatprep.mubr.f32.mxu1 %v561_v2  ;;  %v437_v2 = vld [vmem:[%s2245_s28 + $0x3f8] sm:$0xff] }
  0xf6   : > { %914 = vmatmul.mubr.f32.gmra.mrb[62].mxu0 %v558_v3  ;;  %v434_v3 = vld [vmem:[%s2245_s28 + $0x3e0] sm:$0xff] }
  0xf7   : > { %1139 = vmatmul.mubr.f32.gmra.mrb[62].mxu1 %v560_v4  ;;  %1208 = vmatprep.mubr.f32.mxu0 %v315_v5  ;;  %v436_v4 = vld [vmem:[%s2245_s28 + $0x3f0] sm:$0xff]  ;;  %v443_v5 = vld [vmem:[%s2245_s28 + $0x428] sm:$0xff] }
  0xf8   : > { %1433 = vmatprep.mubr.f32.mxu1 %v317_v6  ;;  %v445_v6 = vld [vmem:[%s2245_s28 + $0x438] sm:$0xff] }
  0xfa   : > { %1209 = vmatmul.mubr.f32.vlgmr.msra.gmra.mrb[64].mxu0 %v314_v7  ;;  %v442_v7 = vld [vmem:[%s2245_s28 + $0x420] sm:$0xff] }
  0xfb   : > { %1434 = vmatmul.mubr.f32.vlgmr.msra.gmra.mrb[64].mxu1 %v316_v8  ;;  %1213 = vmatprep.mubr.f32.mxu0 %v323_v9  ;;  %v444_v8 = vld [vmem:[%s2245_s28 + $0x430] sm:$0xff]  ;;  %v451_v9 = vld [vmem:[%s2245_s28 + $0x468] sm:$0xff] }
  0xfc   : > { %1438 = vmatprep.mubr.f32.mxu1 %v325_v10  ;;  %v453_v10 = vld [vmem:[%s2245_s28 + $0x478] sm:$0xff] }
  0xfe   : > { %1214 = vmatmul.mubr.f32.gmra.mrb[66].mxu0 %v322_v11  ;;  %v450_v11 = vld [vmem:[%s2245_s28 + $0x460] sm:$0xff] }
  0xff   : > { %1439 = vmatmul.mubr.f32.gmra.mrb[66].mxu1 %v324_v0  ;;  %1218 = vmatprep.mubr.f32.mxu0 %v331_v12  ;;  %v452_v0 = vld [vmem:[%s2245_s28 + $0x470] sm:$0xff]  ;;  %v459_v12 = vld [vmem:[%s2245_s28 + $0x4a8] sm:$0xff] }
 0x100   : > { %1443 = vmatprep.mubr.f32.mxu1 %v333_v13  ;;  %v461_v13 = vld [vmem:[%s2245_s28 + $0x4b8] sm:$0xff] }
 0x102   : > { %1219 = vmatmul.mubr.f32.gmra.mrb[68].mxu0 %v330_v14  ;;  %v458_v14 = vld [vmem:[%s2245_s28 + $0x4a0] sm:$0xff] }
 0x103   : > { %1444 = vmatmul.mubr.f32.gmra.mrb[68].mxu1 %v332_v15  ;;  %1223 = vmatprep.mubr.f32.mxu0 %v339_v16  ;;  %v460_v15 = vld [vmem:[%s2245_s28 + $0x4b0] sm:$0xff]  ;;  %v467_v16 = vld [vmem:[%s2245_s28 + $0x4e8] sm:$0xff] }
 0x104   : > { %1448 = vmatprep.mubr.f32.mxu1 %v341_v17  ;;  %v469_v17 = vld [vmem:[%s2245_s28 + $0x4f8] sm:$0xff] }
 0x106   : > { %1224 = vmatmul.mubr.f32.gmra.mrb[70].mxu0 %v338_v18  ;;  %v466_v18 = vld [vmem:[%s2245_s28 + $0x4e0] sm:$0xff] }
 0x107   : > { %1449 = vmatmul.mubr.f32.gmra.mrb[70].mxu1 %v340_v19  ;;  %1228 = vmatprep.mubr.f32.mxu0 %v347_v20  ;;  %v468_v19 = vld [vmem:[%s2245_s28 + $0x4f0] sm:$0xff]  ;;  %v475_v20 = vld [vmem:[%s2245_s28 + $0x528] sm:$0xff] }
 0x108   : > { %1453 = vmatprep.mubr.f32.mxu1 %v349_v21  ;;  %v477_v21 = vld [vmem:[%s2245_s28 + $0x538] sm:$0xff] }
 0x10a   : > { %1229 = vmatmul.mubr.f32.gmra.mrb[72].mxu0 %v346_v22  ;;  %v474_v22 = vld [vmem:[%s2245_s28 + $0x520] sm:$0xff] }
 0x10b   : > { %1454 = vmatmul.mubr.f32.gmra.mrb[72].mxu1 %v348_v23  ;;  %1233 = vmatprep.mubr.f32.mxu0 %v355_v24  ;;  %v476_v23 = vld [vmem:[%s2245_s28 + $0x530] sm:$0xff]  ;;  %v483_v24 = vld [vmem:[%s2245_s28 + $0x568] sm:$0xff] }
 0x10c   : > { %1458 = vmatprep.mubr.f32.mxu1 %v357_v25  ;;  %v485_v25 = vld [vmem:[%s2245_s28 + $0x578] sm:$0xff] }
 0x10e   : > { %1234 = vmatmul.mubr.f32.gmra.mrb[74].mxu0 %v354_v26  ;;  %v482_v26 = vld [vmem:[%s2245_s28 + $0x560] sm:$0xff] }
 0x10f   : > { %1459 = vmatmul.mubr.f32.gmra.mrb[74].mxu1 %v356_v27  ;;  %1238 = vmatprep.mubr.f32.mxu0 %v363_v28  ;;  %v2132_v27 = vmov 0.0   ;;  %v484_v28 = vld [vmem:[%s2245_s28 + $0x570] sm:$0xff] }
 0x110   : > { %1463 = vmatprep.mubr.f32.mxu1 %v365_v29  ;;  %246 = vst.msk [vmem:[%s2671_s6] sm:$0xff] %vm245_vm0, %v2132_v27  ;;  %247 = vst.msk [vmem:[%s2671_s6 + $0x8] sm:$0xff] %vm245_vm0, %v2132_v27  ;;  %v491_v29 = vld [vmem:[%s2245_s28 + $0x5a8] sm:$0xff] }
 0x111   : > { %248 = vst.msk [vmem:[%s2671_s6 + $0x10] sm:$0xff] %vm245_vm0, %v2132_v27  ;;  %249 = vst.msk [vmem:[%s2671_s6 + $0x18] sm:$0xff] %vm245_vm0, %v2132_v27 }
 0x112   : > { %1239 = vmatmul.mubr.f32.gmra.mrb[76].mxu0 %v362_v30  ;;  %250 = vst.msk [vmem:[%s2671_s6 + $0x20] sm:$0xff] %vm245_vm0, %v2132_v27  ;;  %251 = vst.msk [vmem:[%s2671_s6 + $0x28] sm:$0xff] %vm245_vm0, %v2132_v27 }
 0x113   : > { %1464 = vmatmul.mubr.f32.gmra.mrb[76].mxu1 %v364_v31  ;;  %1243 = vmatprep.mubr.f32.mxu0 %v371_v32  ;;  %252 = vst.msk [vmem:[%s2671_s6 + $0x30] sm:$0xff] %vm245_vm0, %v2132_v27  ;;  %253 = vst.msk [vmem:[%s2671_s6 + $0x38] sm:$0xff] %vm245_vm0, %v2132_v27  ;;  %v493_v31 = vld [vmem:[%s2245_s28 + $0x5b8] sm:$0xff] }
 0x114   : > { %1468 = vmatprep.mubr.f32.mxu1 %v373_v33  ;;  %254 = vst.msk [vmem:[%s2671_s6 + $0x40] sm:$0xff] %vm245_vm0, %v2132_v27  ;;  %255 = vst.msk [vmem:[%s2671_s6 + $0x48] sm:$0xff] %vm245_vm0, %v2132_v27 }
 0x115   : > { %256 = vst.msk [vmem:[%s2671_s6 + $0x50] sm:$0xff] %vm245_vm0, %v2132_v27  ;;  %257 = vst.msk [vmem:[%s2671_s6 + $0x58] sm:$0xff] %vm245_vm0, %v2132_v27 }
 0x116   : > { %1244 = vmatmul.mubr.f32.gmra.mrb[78].mxu0 %v370_v34  ;;  %258 = vst.msk [vmem:[%s2671_s6 + $0x60] sm:$0xff] %vm245_vm0, %v2132_v27  ;;  %259 = vst.msk [vmem:[%s2671_s6 + $0x68] sm:$0xff] %vm245_vm0, %v2132_v27 }
 0x117   : > { %1469 = vmatmul.mubr.f32.gmra.mrb[78].mxu1 %v372_v35  ;;  %1248 = vmatprep.mubr.f32.mxu0 %v379_v36  ;;  %260 = vst.msk [vmem:[%s2671_s6 + $0x70] sm:$0xff] %vm245_vm0, %v2132_v27  ;;  %261 = vst.msk [vmem:[%s2671_s6 + $0x78] sm:$0xff] %vm245_vm0, %v2132_v27  ;;  %v490_v36 = vld [vmem:[%s2245_s28 + $0x5a0] sm:$0xff] }
 0x118   : > { %1473 = vmatprep.mubr.f32.mxu1 %v381_v37  ;;  %262 = vst.msk [vmem:[%s2671_s6 + $0x80] sm:$0xff] %vm245_vm0, %v2132_v27  ;;  %263 = vst.msk [vmem:[%s2671_s6 + $0x88] sm:$0xff] %vm245_vm0, %v2132_v27  ;;  %v492_v37 = vld [vmem:[%s2245_s28 + $0x5b0] sm:$0xff] }
 0x119   : > { %264 = vst.msk [vmem:[%s2671_s6 + $0x90] sm:$0xff] %vm245_vm0, %v2132_v27  ;;  %265 = vst.msk [vmem:[%s2671_s6 + $0x98] sm:$0xff] %vm245_vm0, %v2132_v27 }
 0x11a   : > { %1249 = vmatmul.mubr.f32.gmra.mrb[80].mxu0 %v378_v38  ;;  %266 = vst.msk [vmem:[%s2671_s6 + $0xa0] sm:$0xff] %vm245_vm0, %v2132_v27  ;;  %267 = vst.msk [vmem:[%s2671_s6 + $0xa8] sm:$0xff] %vm245_vm0, %v2132_v27  ;;  %v499_v38 = vld [vmem:[%s2245_s28 + $0x5e8] sm:$0xff] }
 0x11b   : > { %1474 = vmatmul.mubr.f32.gmra.mrb[80].mxu1 %v380_v39  ;;  %1253 = vmatprep.mubr.f32.mxu0 %v387_v40  ;;  %268 = vst.msk [vmem:[%s2671_s6 + $0xb0] sm:$0xff] %vm245_vm0, %v2132_v27  ;;  %269 = vst.msk [vmem:[%s2671_s6 + $0xb8] sm:$0xff] %vm245_vm0, %v2132_v27  ;;  %v501_v40 = vld [vmem:[%s2245_s28 + $0x5f8] sm:$0xff] }
 0x11c   : > { %1478 = vmatprep.mubr.f32.mxu1 %v389_v41  ;;  %270 = vst.msk [vmem:[%s2671_s6 + $0xc0] sm:$0xff] %vm245_vm0, %v2132_v27  ;;  %271 = vst.msk [vmem:[%s2671_s6 + $0xc8] sm:$0xff] %vm245_vm0, %v2132_v27 }
 0x11d   : > { %272 = vst.msk [vmem:[%s2671_s6 + $0xd0] sm:$0xff] %vm245_vm0, %v2132_v27  ;;  %273 = vst.msk [vmem:[%s2671_s6 + $0xd8] sm:$0xff] %vm245_vm0, %v2132_v27 }
 0x11e   : > { %1254 = vmatmul.mubr.f32.gmra.mrb[82].mxu0 %v386_v42  ;;  %274 = vst.msk [vmem:[%s2671_s6 + $0xe0] sm:$0xff] %vm245_vm0, %v2132_v27  ;;  %275 = vst.msk [vmem:[%s2671_s6 + $0xe8] sm:$0xff] %vm245_vm0, %v2132_v27 }
 0x11f   : > { %1479 = vmatmul.mubr.f32.gmra.mrb[82].mxu1 %v388_v43  ;;  %1258 = vmatprep.mubr.f32.mxu0 %v395_v44  ;;  %276 = vst.msk [vmem:[%s2671_s6 + $0xf0] sm:$0xff] %vm245_vm0, %v2132_v27  ;;  %277 = vst.msk [vmem:[%s2671_s6 + $0xf8] sm:$0xff] %vm245_vm0, %v2132_v27  ;;  %v540_v27 = vld [vmem:[%s2245_s28 + $0x730] sm:$0xff] }
 0x120   : > { %1483 = vmatprep.mubr.f32.mxu1 %v397_v45  ;;  %v498_v45 = vld [vmem:[%s2245_s28 + $0x5e0] sm:$0xff] }
 0x122   : > { %1259 = vmatmul.mubr.f32.gmra.mrb[84].mxu0 %v394_v46  ;;  %v500_v46 = vld [vmem:[%s2245_s28 + $0x5f0] sm:$0xff] }
 0x123   : > { %1484 = vmatmul.mubr.f32.gmra.mrb[84].mxu1 %v396_v47  ;;  %1263 = vmatprep.mubr.f32.mxu0 %v403_v48  ;;  %v507_v47 = vld [vmem:[%s2245_s28 + $0x628] sm:$0xff] }
 0x124   : > { %1488 = vmatprep.mubr.f32.mxu1 %v405_v49  ;;  %v509_v49 = vld [vmem:[%s2245_s28 + $0x638] sm:$0xff] }
 0x126   : > { %1264 = vmatmul.mubr.f32.gmra.mrb[86].mxu0 %v402_v50 }
 0x127   : > { %1489 = vmatmul.mubr.f32.gmra.mrb[86].mxu1 %v404_v51  ;;  %1268 = vmatprep.mubr.f32.mxu0 %v411_v52 }
 0x128   : > { %1493 = vmatprep.mubr.f32.mxu1 %v413_v53 }
 0x12a   : > { %1269 = vmatmul.mubr.f32.gmra.mrb[88].mxu0 %v410_v54  ;;  %v506_v54 = vld [vmem:[%s2245_s28 + $0x620] sm:$0xff] }
 0x12b   : > { %1494 = vmatmul.mubr.f32.gmra.mrb[88].mxu1 %v412_v55  ;;  %1273 = vmatprep.mubr.f32.mxu0 %v419_v56  ;;  %v508_v55 = vld [vmem:[%s2245_s28 + $0x630] sm:$0xff]  ;;  %v515_v56 = vld [vmem:[%s2245_s28 + $0x668] sm:$0xff] }
 0x12c   : > { %1498 = vmatprep.mubr.f32.mxu1 %v421_v57 }
 0x12e   : > { %1274 = vmatmul.mubr.f32.gmra.mrb[90].mxu0 %v418_v58  ;;  %v517_v58 = vld [vmem:[%s2245_s28 + $0x678] sm:$0xff] }
 0x12f   : > { %1499 = vmatmul.mubr.f32.gmra.mrb[90].mxu1 %v420_v59  ;;  %1278 = vmatprep.mubr.f32.mxu0 %v427_v60 }
 0x130   : > { %1503 = vmatprep.mubr.f32.mxu1 %v429_v61 }
 0x132   : > { %1279 = vmatmul.mubr.f32.gmra.mrb[92].mxu0 %v426_v62 }
 0x133   : > { %1504 = vmatmul.mubr.f32.gmra.mrb[92].mxu1 %v428_v63  ;;  %1283 = vmatprep.mubr.f32.mxu0 %v435_v1  ;;  %v514_v63 = vld [vmem:[%s2245_s28 + $0x660] sm:$0xff]  ;;  %v516_v1 = vld [vmem:[%s2245_s28 + $0x670] sm:$0xff] }
 0x134   : > { %1508 = vmatprep.mubr.f32.mxu1 %v437_v2  ;;  %v523_v2 = vld [vmem:[%s2245_s28 + $0x6a8] sm:$0xff] }
 0x136   : > { %1284 = vmatmul.mubr.f32.gmra.mrb[94].mxu0 %v434_v3 }
 0x137   : > { %1509 = vmatmul.mubr.f32.gmra.mrb[94].mxu1 %v436_v4  ;;  %1288 = vmatprep.mubr.f32.mxu0 %v443_v5  ;;  %v525_v4 = vld [vmem:[%s2245_s28 + $0x6b8] sm:$0xff] }
 0x138   : > { %1513 = vmatprep.mubr.f32.mxu1 %v445_v6 }
 0x13a   : > { %1289 = vmatmul.mubr.f32.gmra.mrb[96].mxu0 %v442_v7 }
 0x13b   : > { %1514 = vmatmul.mubr.f32.gmra.mrb[96].mxu1 %v444_v8  ;;  %1293 = vmatprep.mubr.f32.mxu0 %v451_v9  ;;  %v522_v9 = vld [vmem:[%s2245_s28 + $0x6a0] sm:$0xff] }
 0x13c   : > { %1518 = vmatprep.mubr.f32.mxu1 %v453_v10  ;;  %v524_v10 = vld [vmem:[%s2245_s28 + $0x6b0] sm:$0xff] }
 0x13e   : > { %1294 = vmatmul.mubr.f32.gmra.mrb[98].mxu0 %v450_v11  ;;  %v531_v11 = vld [vmem:[%s2245_s28 + $0x6e8] sm:$0xff] }
 0x13f   : > { %1519 = vmatmul.mubr.f32.gmra.mrb[98].mxu1 %v452_v0  ;;  %1298 = vmatprep.mubr.f32.mxu0 %v459_v12  ;;  %v533_v12 = vld [vmem:[%s2245_s28 + $0x6f8] sm:$0xff] }
 0x140   : > { %1523 = vmatprep.mubr.f32.mxu1 %v461_v13 }
 0x142   : > { %1299 = vmatmul.mubr.f32.gmra.mrb[100].mxu0 %v458_v14 }
 0x143   : > { %1524 = vmatmul.mubr.f32.gmra.mrb[100].mxu1 %v460_v15  ;;  %1303 = vmatprep.mubr.f32.mxu0 %v467_v16 }
 0x144   : > { %1528 = vmatprep.mubr.f32.mxu1 %v469_v17  ;;  %v530_v17 = vld [vmem:[%s2245_s28 + $0x6e0] sm:$0xff] }
 0x146   : > { %1304 = vmatmul.mubr.f32.gmra.mrb[102].mxu0 %v466_v18  ;;  %v532_v18 = vld [vmem:[%s2245_s28 + $0x6f0] sm:$0xff] }
 0x147   : > { %1529 = vmatmul.mubr.f32.gmra.mrb[102].mxu1 %v468_v19  ;;  %1308 = vmatprep.mubr.f32.mxu0 %v475_v20  ;;  %v539_v19 = vld [vmem:[%s2245_s28 + $0x728] sm:$0xff] }
 0x148   : > { %1533 = vmatprep.mubr.f32.mxu1 %v477_v21  ;;  %v541_v21 = vld [vmem:[%s2245_s28 + $0x738] sm:$0xff] }
 0x14a   : > { %1309 = vmatmul.mubr.f32.gmra.mrb[104].mxu0 %v474_v22 }
 0x14b   : > { %1534 = vmatmul.mubr.f32.gmra.mrb[104].mxu1 %v476_v23  ;;  %1313 = vmatprep.mubr.f32.mxu0 %v483_v24 }
 0x14c   : > { %1538 = vmatprep.mubr.f32.mxu1 %v485_v25 }
 0x14d   : > { %v760_v30 = vpop.f32.mrb[0].mxu0 }
 0x14e   : > { %v762_v32 = vpop.f32.mrb[1].mxu0  ;;  %v985_v33 = vpop.f32.mrb[0].mxu1  ;;  %1314 = vmatmul.mubr.f32.gmra.mrb[106].mxu0 %v482_v26  ;;  %v538_v26 = vld [vmem:[%s2245_s28 + $0x720] sm:$0xff] }
 0x14f   : > { %v2741_v34 = vadd.f32 %v985_v33, %v760_v30  ;;  %v987_v35 = vpop.f32.mrb[1].mxu1  ;;  %1539 = vmatmul.mubr.f32.gmra.mrb[106].mxu1 %v484_v28  ;;  %1318 = vmatprep.mubr.f32.mxu0 %v491_v29  ;;  %v547_v28 = vld [vmem:[%s2245_s28 + $0x768] sm:$0xff]  ;;  %v549_v30 = vld [vmem:[%s2245_s28 + $0x778] sm:$0xff] }
 0x150   : > { %1543 = vmatprep.mubr.f32.mxu1 %v493_v31 }
 0x151   : > { %v765_v39 = vpop.f32.mrb[2].mxu0 }
 0x152   : > { %v767_v41 = vpop.f32.mrb[3].mxu0  ;;  %v990_v42 = vpop.f32.mrb[2].mxu1  ;;  %1319 = vmatmul.mubr.f32.gmra.mrb[108].mxu0 %v490_v36  ;;  %v546_v36 = vld [vmem:[%s2245_s28 + $0x760] sm:$0xff] }
 0x153   : > { %v2747_v43 = vadd.f32 %v990_v42, %v765_v39  ;;  %v992_v44 = vpop.f32.mrb[3].mxu1  ;;  %1544 = vmatmul.mubr.f32.gmra.mrb[108].mxu1 %v492_v37  ;;  %1323 = vmatprep.mubr.f32.mxu0 %v499_v38  ;;  %v548_v37 = vld [vmem:[%s2245_s28 + $0x770] sm:$0xff]  ;;  %v555_v38 = vld [vmem:[%s2245_s28 + $0x7a8] sm:$0xff] }
 0x154   : > { %1548 = vmatprep.mubr.f32.mxu1 %v501_v40  ;;  %v557_v40 = vld [vmem:[%s2245_s28 + $0x7b8] sm:$0xff] }
 0x155   : > { %v770_v48 = vpop.f32.mrb[4].mxu0 }
 0x156   : > { %v772_v50 = vpop.f32.mrb[5].mxu0  ;;  %v995_v51 = vpop.f32.mrb[4].mxu1  ;;  %1324 = vmatmul.mubr.f32.gmra.mrb[110].mxu0 %v498_v45 }
 0x157   : > { %v2753_v52 = vadd.f32 %v995_v51, %v770_v48  ;;  %v997_v53 = vpop.f32.mrb[5].mxu1  ;;  %1549 = vmatmul.mubr.f32.gmra.mrb[110].mxu1 %v500_v46  ;;  %1328 = vmatprep.mubr.f32.mxu0 %v507_v47  ;;  %v554_v46 = vld [vmem:[%s2245_s28 + $0x7a0] sm:$0xff]  ;;  %v556_v47 = vld [vmem:[%s2245_s28 + $0x7b0] sm:$0xff]  ;;  %v563_v48 = vld [vmem:[%s2245_s28 + $0x7e8] sm:$0xff] }
 0x158   : > { %1553 = vmatprep.mubr.f32.mxu1 %v509_v49  ;;  %v565_v50 = vld [vmem:[%s2245_s28 + $0x7f8] sm:$0xff] }
 0x159   : > { %v775_v57 = vpop.f32.mrb[6].mxu0 }
 0x15a   : > { %v777_v59 = vpop.f32.mrb[7].mxu0  ;;  %v1000_v60 = vpop.f32.mrb[6].mxu1  ;;  %1329 = vmatmul.mubr.f32.gmra.mrb[112].mxu0 %v506_v54 }
 0x15b   : > { %v2759_v61 = vadd.f32 %v1000_v60, %v775_v57  ;;  %v1002_v62 = vpop.f32.mrb[7].mxu1  ;;  %1554 = vmatmul.mubr.f32.gmra.mrb[112].mxu1 %v508_v55  ;;  %1333 = vmatprep.mubr.f32.mxu0 %v515_v56  ;;  %v562_v56 = vld [vmem:[%s2245_s28 + $0x7e0] sm:$0xff]  ;;  %v564_v57 = vld [vmem:[%s2245_s28 + $0x7f0] sm:$0xff] }
 0x15c   : > { %1558 = vmatprep.mubr.f32.mxu1 %v517_v58 }
 0x15d   : > { %v780_v3 = vpop.f32.mrb[8].mxu0 }
 0x15e   : > { %v782_v5 = vpop.f32.mrb[9].mxu0  ;;  %v1005_v6 = vpop.f32.mrb[8].mxu1  ;;  %1334 = vmatmul.mubr.f32.gmra.mrb[114].mxu0 %v514_v63 }
 0x15f   : > { %v2765_v7 = vadd.f32 %v1005_v6, %v780_v3  ;;  %v1007_v8 = vpop.f32.mrb[9].mxu1  ;;  %1559 = vmatmul.mubr.f32.gmra.mrb[114].mxu1 %v516_v1  ;;  %1338 = vmatprep.mubr.f32.mxu0 %v523_v2 }
 0x160   : > { %1563 = vmatprep.mubr.f32.mxu1 %v525_v4 }
 0x161   : > { %v785_v0 = vpop.f32.mrb[10].mxu0 }
 0x162   : > { %v787_v13 = vpop.f32.mrb[11].mxu0  ;;  %v1010_v14 = vpop.f32.mrb[10].mxu1  ;;  %1339 = vmatmul.mubr.f32.gmra.mrb[116].mxu0 %v522_v9 }
 0x163   : > { %v2771_v15 = vadd.f32 %v1010_v14, %v785_v0  ;;  %v1012_v16 = vpop.f32.mrb[11].mxu1  ;;  %1564 = vmatmul.mubr.f32.gmra.mrb[116].mxu1 %v524_v10  ;;  %1343 = vmatprep.mubr.f32.mxu0 %v531_v11 }
 0x164   : > { %1568 = vmatprep.mubr.f32.mxu1 %v533_v12 }
 0x165   : > { %v790_v20 = vpop.f32.mrb[12].mxu0 }
 0x166   : > { %v792_v22 = vpop.f32.mrb[13].mxu0  ;;  %v1015_v23 = vpop.f32.mrb[12].mxu1  ;;  %1344 = vmatmul.mubr.f32.gmra.mrb[118].mxu0 %v530_v17 }
 0x167   : > { %v2777_v24 = vadd.f32 %v1015_v23, %v790_v20  ;;  %v1017_v25 = vpop.f32.mrb[13].mxu1  ;;  %1569 = vmatmul.mubr.f32.gmra.mrb[118].mxu1 %v532_v18  ;;  %1348 = vmatprep.mubr.f32.mxu0 %v539_v19 }
 0x168   : > { %1573 = vmatprep.mubr.f32.mxu1 %v541_v21 }
 0x169   : > { %v795_v29 = vpop.f32.mrb[14].mxu0 }
 0x16a   : > { %v797_v31 = vpop.f32.mrb[15].mxu0  ;;  %v1020_v32 = vpop.f32.mrb[14].mxu1  ;;  %1349 = vmatmul.mubr.f32.gmra.mrb[120].mxu0 %v538_v26 }
 0x16b   : > { %v2783_v33 = vadd.f32 %v1020_v32, %v795_v29  ;;  %v1022_v35 = vpop.f32.mrb[15].mxu1  ;;  %1574 = vmatmul.mubr.f32.gmra.mrb[120].mxu1 %v540_v27  ;;  %1353 = vmatprep.mubr.f32.mxu0 %v547_v28 }
 0x16c   : > { %1578 = vmatprep.mubr.f32.mxu1 %v549_v30 }
 0x16d   : > { %v800_v39 = vpop.f32.mrb[16].mxu0 }
 0x16e   : > { %v802_v41 = vpop.f32.mrb[17].mxu0  ;;  %v1025_v42 = vpop.f32.mrb[16].mxu1  ;;  %1354 = vmatmul.mubr.f32.gmra.mrb[122].mxu0 %v546_v36 }
 0x16f   : > { %v2789_v44 = vadd.f32 %v1025_v42, %v800_v39  ;;  %v1027_v45 = vpop.f32.mrb[17].mxu1  ;;  %1579 = vmatmul.mubr.f32.gmra.mrb[122].mxu1 %v548_v37  ;;  %1358 = vmatprep.mubr.f32.mxu0 %v555_v38 }
 0x170   : > { %1583 = vmatprep.mubr.f32.mxu1 %v557_v40 }
 0x171   : > { %v805_v49 = vpop.f32.mrb[18].mxu0 }
 0x172   : > { %v807_v51 = vpop.f32.mrb[19].mxu0  ;;  %v1030_v53 = vpop.f32.mrb[18].mxu1  ;;  %1359 = vmatmul.mubr.f32.gmra.mrb[124].mxu0 %v554_v46 }
 0x173   : > { %v2795_v54 = vadd.f32 %v1030_v53, %v805_v49  ;;  %v1032_v55 = vpop.f32.mrb[19].mxu1  ;;  %1584 = vmatmul.mubr.f32.gmra.mrb[124].mxu1 %v556_v47  ;;  %1363 = vmatprep.mubr.f32.mxu0 %v563_v48 }
 0x174   : > { %1588 = vmatprep.mubr.f32.mxu1 %v565_v50 }
 0x175   : > { %v810_v58 = vpop.f32.mrb[20].mxu0 }
 0x176   : > { %v812_v59 = vpop.f32.mrb[21].mxu0  ;;  %v1035_v60 = vpop.f32.mrb[20].mxu1  ;;  %1364 = vmatmul.mubr.f32.gmra.mrb[126].mxu0 %v562_v56 }
 0x177   : > { %v2799_v62 = vadd.f32 %v1035_v60, %v810_v58  ;;  %v1037_v63 = vpop.f32.mrb[21].mxu1  ;;  %1589 = vmatmul.mubr.f32.gmra.mrb[126].mxu1 %v564_v57 }
 0x179   : > { %v815_v1 = vpop.f32.mrb[22].mxu0 }
 0x17a   : > { %v817_v2 = vpop.f32.mrb[23].mxu0  ;;  %v1040_v3 = vpop.f32.mrb[22].mxu1 }
 0x17b   : > { %v2801_v4 = vadd.f32 %v1040_v3, %v815_v1  ;;  %v1042_v5 = vpop.f32.mrb[23].mxu1 }
 0x17d   : > { %v820_v6 = vpop.f32.mrb[24].mxu0 }
 0x17e   : > { %v822_v8 = vpop.f32.mrb[25].mxu0  ;;  %v1045_v9 = vpop.f32.mrb[24].mxu1 }
 0x17f   : > { %v2803_v10 = vadd.f32 %v1045_v9, %v820_v6  ;;  %v1047_v11 = vpop.f32.mrb[25].mxu1 }
 0x181   : > { %v825_v0 = vpop.f32.mrb[26].mxu0 }
 0x182   : > { %v827_v12 = vpop.f32.mrb[27].mxu0  ;;  %v1050_v13 = vpop.f32.mrb[26].mxu1 }
 0x183   : > { %v2805_v14 = vadd.f32 %v1050_v13, %v825_v0  ;;  %v1052_v16 = vpop.f32.mrb[27].mxu1 }
 0x185   : > { %v830_v17 = vpop.f32.mrb[28].mxu0 }
 0x186   : > { %v832_v18 = vpop.f32.mrb[29].mxu0  ;;  %v1055_v19 = vpop.f32.mrb[28].mxu1 }
 0x187   : > { %v2807_v20 = vadd.f32 %v1055_v19, %v830_v17  ;;  %v1057_v21 = vpop.f32.mrb[29].mxu1 }
 0x189   : > { %v835_v22 = vpop.f32.mrb[30].mxu0 }
 0x18a   : > { %v837_v23 = vpop.f32.mrb[31].mxu0  ;;  %v1060_v25 = vpop.f32.mrb[30].mxu1 }
 0x18b   : > { %v2809_v26 = vadd.f32 %v1060_v25, %v835_v22  ;;  %v1062_v27 = vpop.f32.mrb[31].mxu1 }
 0x18d   : > { %v840_v28 = vpop.f32.mrb[32].mxu0 }
 0x18e   : > { %v842_v29 = vpop.f32.mrb[33].mxu0  ;;  %v1065_v30 = vpop.f32.mrb[32].mxu1 }
 0x18f   : > { %v2811_v31 = vadd.f32 %v1065_v30, %v840_v28  ;;  %v1067_v32 = vpop.f32.mrb[33].mxu1 }
 0x191   : > { %v845_v35 = vpop.f32.mrb[34].mxu0 }
 0x192   : > { %v847_v36 = vpop.f32.mrb[35].mxu0  ;;  %v1070_v37 = vpop.f32.mrb[34].mxu1 }
 0x193   : > { %v2813_v38 = vadd.f32 %v1070_v37, %v845_v35  ;;  %v1072_v39 = vpop.f32.mrb[35].mxu1 }
 0x195   : > { %v850_v40 = vpop.f32.mrb[36].mxu0 }
 0x196   : > { %v852_v41 = vpop.f32.mrb[37].mxu0  ;;  %v1075_v42 = vpop.f32.mrb[36].mxu1 }
 0x197   : > { %v2815_v45 = vadd.f32 %v1075_v42, %v850_v40  ;;  %v1077_v46 = vpop.f32.mrb[37].mxu1 }
 0x199   : > { %v855_v47 = vpop.f32.mrb[38].mxu0 }
 0x19a   : > { %v857_v48 = vpop.f32.mrb[39].mxu0  ;;  %v1080_v49 = vpop.f32.mrb[38].mxu1 }
 0x19b   : > { %v2817_v50 = vadd.f32 %v1080_v49, %v855_v47  ;;  %v1082_v51 = vpop.f32.mrb[39].mxu1 }
 0x19d   : > { %v860_v53 = vpop.f32.mrb[40].mxu0 }
 0x19e   : > { %v862_v55 = vpop.f32.mrb[41].mxu0  ;;  %v1085_v56 = vpop.f32.mrb[40].mxu1 }
 0x19f   : > { %v2819_v57 = vadd.f32 %v1085_v56, %v860_v53  ;;  %v1087_v58 = vpop.f32.mrb[41].mxu1 }
 0x1a1   : > { %v865_v59 = vpop.f32.mrb[42].mxu0 }
 0x1a2   : > { %v867_v60 = vpop.f32.mrb[43].mxu0  ;;  %v1090_v63 = vpop.f32.mrb[42].mxu1 }
 0x1a3   : > { %v2821_v1 = vadd.f32 %v1090_v63, %v865_v59  ;;  %v1092_v2 = vpop.f32.mrb[43].mxu1 }
 0x1a5   : > { %v870_v3 = vpop.f32.mrb[44].mxu0 }
 0x1a6   : > { %v872_v5 = vpop.f32.mrb[45].mxu0  ;;  %v1095_v6 = vpop.f32.mrb[44].mxu1 }
 0x1a7   : > { %v2823_v8 = vadd.f32 %v1095_v6, %v870_v3  ;;  %v1097_v9 = vpop.f32.mrb[45].mxu1 }
 0x1a9   : > { %v875_v11 = vpop.f32.mrb[46].mxu0 }
 0x1aa   : > { %v877_v0 = vpop.f32.mrb[47].mxu0  ;;  %v1100_v12 = vpop.f32.mrb[46].mxu1 }
 0x1ab   : > { %v2825_v13 = vadd.f32 %v1100_v12, %v875_v11  ;;  %v1102_v16 = vpop.f32.mrb[47].mxu1 }
 0x1ad   : > { %v880_v17 = vpop.f32.mrb[48].mxu0 }
 0x1ae   : > { %v882_v18 = vpop.f32.mrb[49].mxu0  ;;  %v1105_v19 = vpop.f32.mrb[48].mxu1 }
 0x1af   : > { %v2827_v21 = vadd.f32 %v1105_v19, %v880_v17  ;;  %v1107_v22 = vpop.f32.mrb[49].mxu1 }
 0x1b1   : > { %v885_v23 = vpop.f32.mrb[50].mxu0 }
 0x1b2   : > { %v887_v25 = vpop.f32.mrb[51].mxu0  ;;  %v1110_v27 = vpop.f32.mrb[50].mxu1 }
 0x1b3   : > { %v2829_v28 = vadd.f32 %v1110_v27, %v885_v23  ;;  %v1112_v29 = vpop.f32.mrb[51].mxu1  ;;  %v278_v23 = vld [vmem:[%s2671_s6] sm:$0xff] }
 0x1b5   : > { %v890_v30 = vpop.f32.mrb[52].mxu0 }
 0x1b6   : > { %v892_v32 = vpop.f32.mrb[53].mxu0  ;;  %v1115_v35 = vpop.f32.mrb[52].mxu1 }
 0x1b7   : > { %v2831_v36 = vadd.f32 %v1115_v35, %v890_v30  ;;  %v1117_v37 = vpop.f32.mrb[53].mxu1 }
 0x1b9   : > { %v895_v39 = vpop.f32.mrb[54].mxu0 }
 0x1ba   : > { %v897_v40 = vpop.f32.mrb[55].mxu0  ;;  %v1120_v41 = vpop.f32.mrb[54].mxu1 }
 0x1bb   : > { %v2833_v42 = vadd.f32 %v1120_v41, %v895_v39  ;;  %v1122_v46 = vpop.f32.mrb[55].mxu1  ;;  %v279_v39 = vld [vmem:[%s2671_s6 + $0x8] sm:$0xff] }
 0x1bd   : > { %v900_v47 = vpop.f32.mrb[56].mxu0 }
 0x1be   : > { %v902_v48 = vpop.f32.mrb[57].mxu0  ;;  %v1125_v49 = vpop.f32.mrb[56].mxu1 }
 0x1bf   : > { %v2835_v51 = vadd.f32 %v1125_v49, %v900_v47  ;;  %v1127_v53 = vpop.f32.mrb[57].mxu1 }
 0x1c0   : > { %v280_v53 = vld [vmem:[%s2671_s6 + $0x10] sm:$0xff] }
 0x1c1   : > { %v905_v55 = vpop.f32.mrb[58].mxu0 }
 0x1c2   : > { %v907_v56 = vpop.f32.mrb[59].mxu0  ;;  %v1130_v58 = vpop.f32.mrb[58].mxu1 }
 0x1c3   : > { %v2837_v59 = vadd.f32 %v1130_v58, %v905_v55  ;;  %v1132_v60 = vpop.f32.mrb[59].mxu1 }
 0x1c5   : > { %v910_v63 = vpop.f32.mrb[60].mxu0 }
 0x1c6   : > { %v912_v2 = vpop.f32.mrb[61].mxu0  ;;  %v1135_v3 = vpop.f32.mrb[60].mxu1 }
 0x1c7   : > { %v2839_v5 = vadd.f32 %v1135_v3, %v910_v63  ;;  %v1137_v6 = vpop.f32.mrb[61].mxu1  ;;  %v281_v3 = vld [vmem:[%s2671_s6 + $0x18] sm:$0xff] }
 0x1c9   : > { %v915_v9 = vpop.f32.mrb[62].mxu0 }
 0x1ca   : > { %v917_v11 = vpop.f32.mrb[63].mxu0  ;;  %v1140_v0 = vpop.f32.mrb[62].mxu1 }
 0x1cb   : > { %v2841_v12 = vadd.f32 %v1140_v0, %v915_v9  ;;  %v1142_v16 = vpop.f32.mrb[63].mxu1 }
 0x1cd   : > { %v1210_v17 = vpop.f32.mrb[64].mxu0 }
 0x1ce   : > { %v1211_v18 = vadd.f32 %v1210_v17, %v2741_v34  ;;  %v1212_v19 = vpop.f32.mrb[65].mxu0  ;;  %v1435_v22 = vpop.f32.mrb[64].mxu1 }
 0x1cf   : > { %v1437_v25 = vpop.f32.mrb[65].mxu1 }
 0x1d0   : > { %v1436_v27 = vadd.f32 %v1435_v22, %v1211_v18  ;;  %v282_v18 = vld [vmem:[%s2671_s6 + $0x20] sm:$0xff] }
 0x1d1   : > { %v1215_v29 = vpop.f32.mrb[66].mxu0 }
 0x1d2   : > { %v1594_v30 = vadd.f32 %v1436_v27, %v278_v23  ;;  %v1216_v32 = vadd.f32 %v1215_v29, %v2747_v43  ;;  %v1217_v35 = vpop.f32.mrb[67].mxu0  ;;  %v1440_v37 = vpop.f32.mrb[66].mxu1 }
 0x1d3   : > { %v1442_v40 = vpop.f32.mrb[67].mxu1 }
 0x1d4   : > { %1627 = vst.msk [vmem:[%s2671_s6] sm:$0xff] %vm245_vm0, %v1594_v30  ;;  %v1441_v41 = vadd.f32 %v1440_v37, %v1216_v32  ;;  %v283_v30 = vld [vmem:[%s2671_s6 + $0x28] sm:$0xff] }
 0x1d5   : > { %v1220_v34 = vpop.f32.mrb[68].mxu0 }
 0x1d6   : > { %v1595_v46 = vadd.f32 %v1441_v41, %v279_v39  ;;  %v1221_v47 = vadd.f32 %v1220_v34, %v2753_v52  ;;  %v1222_v48 = vpop.f32.mrb[69].mxu0  ;;  %v1445_v49 = vpop.f32.mrb[68].mxu1  ;;  %v284_v34 = vld [vmem:[%s2671_s6 + $0x30] sm:$0xff] }
 0x1d7   : > { %v1447_v55 = vpop.f32.mrb[69].mxu1 }
 0x1d8   : > { %1628 = vst.msk [vmem:[%s2671_s6 + $0x8] sm:$0xff] %vm245_vm0, %v1595_v46  ;;  %v1446_v43 = vadd.f32 %v1445_v49, %v1221_v47 }
 0x1d9   : > { %v1225_v56 = vpop.f32.mrb[70].mxu0 }
 0x1da   : > { %v1596_v58 = vadd.f32 %v1446_v43, %v280_v53  ;;  %v1226_v60 = vadd.f32 %v1225_v56, %v2759_v61  ;;  %v1227_v63 = vpop.f32.mrb[71].mxu0  ;;  %v1450_v2 = vpop.f32.mrb[70].mxu1  ;;  %v285_v43 = vld [vmem:[%s2671_s6 + $0x38] sm:$0xff] }
 0x1db   : > { %v1452_v6 = vpop.f32.mrb[71].mxu1 }
 0x1dc   : > { %1629 = vst.msk [vmem:[%s2671_s6 + $0x10] sm:$0xff] %vm245_vm0, %v1596_v58  ;;  %v1451_v52 = vadd.f32 %v1450_v2, %v1226_v60  ;;  %v286_v6 = vld [vmem:[%s2671_s6 + $0x40] sm:$0xff] }
 0x1dd   : > { %v1230_v9 = vpop.f32.mrb[72].mxu0 }
 0x1de   : > { %v1597_v11 = vadd.f32 %v1451_v52, %v281_v3  ;;  %v1231_v0 = vadd.f32 %v1230_v9, %v2765_v7  ;;  %v1232_v16 = vpop.f32.mrb[73].mxu0  ;;  %v1455_v17 = vpop.f32.mrb[72].mxu1 }
 0x1df   : > { %v1457_v19 = vpop.f32.mrb[73].mxu1 }
 0x1e0   : > { %1630 = vst.msk [vmem:[%s2671_s6 + $0x18] sm:$0xff] %vm245_vm0, %v1597_v11  ;;  %v1456_v61 = vadd.f32 %v1455_v17, %v1231_v0 }
 0x1e1   : > { %v1235_v22 = vpop.f32.mrb[74].mxu0 }
 0x1e2   : > { %v1598_v23 = vadd.f32 %v1456_v61, %v282_v18  ;;  %v1236_v25 = vadd.f32 %v1235_v22, %v2771_v15  ;;  %v1237_v27 = vpop.f32.mrb[75].mxu0  ;;  %v1460_v29 = vpop.f32.mrb[74].mxu1  ;;  %v287_v18 = vld [vmem:[%s2671_s6 + $0x48] sm:$0xff] }
 0x1e3   : > { %v1462_v32 = vpop.f32.mrb[75].mxu1 }
 0x1e4   : > { %1631 = vst.msk [vmem:[%s2671_s6 + $0x20] sm:$0xff] %vm245_vm0, %v1598_v23  ;;  %v1461_v7 = vadd.f32 %v1460_v29, %v1236_v25  ;;  %v288_v29 = vld [vmem:[%s2671_s6 + $0x50] sm:$0xff] }
 0x1e5   : > { %v1240_v35 = vpop.f32.mrb[76].mxu0 }
 0x1e6   : > { %v1599_v37 = vadd.f32 %v1461_v7, %v283_v30  ;;  %v1241_v39 = vadd.f32 %v1240_v35, %v2777_v24  ;;  %v1242_v40 = vpop.f32.mrb[77].mxu0  ;;  %v1465_v41 = vpop.f32.mrb[76].mxu1 }
 0x1e7   : > { %v1467_v46 = vpop.f32.mrb[77].mxu1  ;;  %v289_v40 = vld [vmem:[%s2671_s6 + $0x58] sm:$0xff] }
 0x1e8   : > { %1632 = vst.msk [vmem:[%s2671_s6 + $0x28] sm:$0xff] %vm245_vm0, %v1599_v37  ;;  %v1466_v15 = vadd.f32 %v1465_v41, %v1241_v39 }
 0x1e9   : > { %v1245_v47 = vpop.f32.mrb[78].mxu0 }
 0x1ea   : > { %v1600_v48 = vadd.f32 %v1466_v15, %v284_v34  ;;  %v1246_v49 = vadd.f32 %v1245_v47, %v2783_v33  ;;  %v1247_v53 = vpop.f32.mrb[79].mxu0  ;;  %v1470_v55 = vpop.f32.mrb[78].mxu1 }
 0x1eb   : > { %v1472_v56 = vpop.f32.mrb[79].mxu1 }
 0x1ec   : > { %1633 = vst.msk [vmem:[%s2671_s6 + $0x30] sm:$0xff] %vm245_vm0, %v1600_v48  ;;  %v1471_v24 = vadd.f32 %v1470_v55, %v1246_v49  ;;  %v290_v49 = vld [vmem:[%s2671_s6 + $0x60] sm:$0xff] }
 0x1ed   : > { %v1250_v58 = vpop.f32.mrb[80].mxu0 }
 0x1ee   : > { %v1601_v60 = vadd.f32 %v1471_v24, %v285_v43  ;;  %v1251_v63 = vadd.f32 %v1250_v58, %v2789_v44  ;;  %v1252_v2 = vpop.f32.mrb[81].mxu0  ;;  %v1475_v3 = vpop.f32.mrb[80].mxu1 }
 0x1ef   : > { %v1477_v52 = vpop.f32.mrb[81].mxu1 }
 0x1f0   : > { %1634 = vst.msk [vmem:[%s2671_s6 + $0x38] sm:$0xff] %vm245_vm0, %v1601_v60  ;;  %v1476_v33 = vadd.f32 %v1475_v3, %v1251_v63  ;;  %v291_v60 = vld [vmem:[%s2671_s6 + $0x68] sm:$0xff] }
 0x1f1   : > { %v1255_v9 = vpop.f32.mrb[82].mxu0 }
 0x1f2   : > { %v1602_v11 = vadd.f32 %v1476_v33, %v286_v6  ;;  %v1256_v0 = vadd.f32 %v1255_v9, %v2795_v54  ;;  %v1257_v16 = vpop.f32.mrb[83].mxu0  ;;  %v1480_v17 = vpop.f32.mrb[82].mxu1  ;;  %v292_v9 = vld [vmem:[%s2671_s6 + $0x70] sm:$0xff] }
 0x1f3   : > { %v1482_v19 = vpop.f32.mrb[83].mxu1 }
 0x1f4   : > { %1635 = vst.msk [vmem:[%s2671_s6 + $0x40] sm:$0xff] %vm245_vm0, %v1602_v11  ;;  %v1481_v44 = vadd.f32 %v1480_v17, %v1256_v0 }
 0x1f5   : > { %v1260_v61 = vpop.f32.mrb[84].mxu0 }
 0x1f6   : > { %v1603_v22 = vadd.f32 %v1481_v44, %v287_v18  ;;  %v1261_v23 = vadd.f32 %v1260_v61, %v2799_v62  ;;  %v1262_v25 = vpop.f32.mrb[85].mxu0  ;;  %v1485_v27 = vpop.f32.mrb[84].mxu1  ;;  %v293_v44 = vld [vmem:[%s2671_s6 + $0x78] sm:$0xff] }
 0x1f7   : > { %v1487_v30 = vpop.f32.mrb[85].mxu1 }
 0x1f8   : > { %1636 = vst.msk [vmem:[%s2671_s6 + $0x48] sm:$0xff] %vm245_vm0, %v1603_v22  ;;  %v1486_v54 = vadd.f32 %v1485_v27, %v1261_v23  ;;  %v294_v30 = vld [vmem:[%s2671_s6 + $0x80] sm:$0xff] }
 0x1f9   : > { %v1265_v32 = vpop.f32.mrb[86].mxu0 }
 0x1fa   : > { %v1604_v7 = vadd.f32 %v1486_v54, %v288_v29  ;;  %v1266_v35 = vadd.f32 %v1265_v32, %v2801_v4  ;;  %v1267_v37 = vpop.f32.mrb[87].mxu0  ;;  %v1490_v39 = vpop.f32.mrb[86].mxu1 }
 0x1fb   : > { %v1492_v41 = vpop.f32.mrb[87].mxu1 }
 0x1fc   : > { %1637 = vst.msk [vmem:[%s2671_s6 + $0x50] sm:$0xff] %vm245_vm0, %v1604_v7  ;;  %v1491_v62 = vadd.f32 %v1490_v39, %v1266_v35 }
 0x1fd   : > { %v1270_v34 = vpop.f32.mrb[88].mxu0 }
 0x1fe   : > { %v1605_v46 = vadd.f32 %v1491_v62, %v289_v40  ;;  %v1271_v15 = vadd.f32 %v1270_v34, %v2803_v10  ;;  %v1272_v47 = vpop.f32.mrb[89].mxu0  ;;  %v1495_v48 = vpop.f32.mrb[88].mxu1  ;;  %v295_v40 = vld [vmem:[%s2671_s6 + $0x88] sm:$0xff] }
 0x1ff   : > { %v1497_v53 = vpop.f32.mrb[89].mxu1 }
 0x200   : > { %1638 = vst.msk [vmem:[%s2671_s6 + $0x58] sm:$0xff] %vm245_vm0, %v1605_v46  ;;  %v1496_v4 = vadd.f32 %v1495_v48, %v1271_v15  ;;  %v296_v48 = vld [vmem:[%s2671_s6 + $0x90] sm:$0xff] }
 0x201   : > { %v1275_v55 = vpop.f32.mrb[90].mxu0 }
 0x202   : > { %v1606_v43 = vadd.f32 %v1496_v4, %v290_v49  ;;  %v1276_v56 = vadd.f32 %v1275_v55, %v2805_v14  ;;  %v1277_v24 = vpop.f32.mrb[91].mxu0  ;;  %v1500_v58 = vpop.f32.mrb[90].mxu1 }
 0x203   : > { %v1502_v63 = vpop.f32.mrb[91].mxu1  ;;  %v297_v24 = vld [vmem:[%s2671_s6 + $0x98] sm:$0xff] }
 0x204   : > { %1639 = vst.msk [vmem:[%s2671_s6 + $0x60] sm:$0xff] %vm245_vm0, %v1606_v43  ;;  %v1501_v10 = vadd.f32 %v1500_v58, %v1276_v56 }
 0x205   : > { %v1280_v2 = vpop.f32.mrb[92].mxu0 }
 0x206   : > { %v1607_v3 = vadd.f32 %v1501_v10, %v291_v60  ;;  %v1281_v6 = vadd.f32 %v1280_v2, %v2807_v20  ;;  %v1282_v52 = vpop.f32.mrb[93].mxu0  ;;  %v1505_v33 = vpop.f32.mrb[92].mxu1 }
 0x207   : > { %v1507_v11 = vpop.f32.mrb[93].mxu1 }
 0x208   : > { %1640 = vst.msk [vmem:[%s2671_s6 + $0x68] sm:$0xff] %vm245_vm0, %v1607_v3  ;;  %v1506_v14 = vadd.f32 %v1505_v33, %v1281_v6  ;;  %v298_v6 = vld [vmem:[%s2671_s6 + $0xa0] sm:$0xff] }
 0x209   : > { %v1285_v0 = vpop.f32.mrb[94].mxu0 }
 0x20a   : > { %v1608_v16 = vadd.f32 %v1506_v14, %v292_v9  ;;  %v1286_v17 = vadd.f32 %v1285_v0, %v2809_v26  ;;  %v1287_v18 = vpop.f32.mrb[95].mxu0  ;;  %v1510_v19 = vpop.f32.mrb[94].mxu1 }
 0x20b   : > { %v1512_v61 = vpop.f32.mrb[95].mxu1 }
 0x20c   : > { %1641 = vst.msk [vmem:[%s2671_s6 + $0x70] sm:$0xff] %vm245_vm0, %v1608_v16  ;;  %v1511_v20 = vadd.f32 %v1510_v19, %v1286_v17  ;;  %v299_v16 = vld [vmem:[%s2671_s6 + $0xa8] sm:$0xff] }
 0x20d   : > { %v1290_v22 = vpop.f32.mrb[96].mxu0 }
 0x20e   : > { %v1609_v23 = vadd.f32 %v1511_v20, %v293_v44  ;;  %v1291_v25 = vadd.f32 %v1290_v22, %v2811_v31  ;;  %v1292_v27 = vpop.f32.mrb[97].mxu0  ;;  %v1515_v29 = vpop.f32.mrb[96].mxu1  ;;  %v300_v22 = vld [vmem:[%s2671_s6 + $0xb0] sm:$0xff] }
 0x20f   : > { %v1517_v54 = vpop.f32.mrb[97].mxu1 }
 0x210   : > { %1642 = vst.msk [vmem:[%s2671_s6 + $0x78] sm:$0xff] %vm245_vm0, %v1609_v23  ;;  %v1516_v26 = vadd.f32 %v1515_v29, %v1291_v25 }
 0x211   : > { %v1295_v32 = vpop.f32.mrb[98].mxu0 }
 0x212   : > { %v1610_v7 = vadd.f32 %v1516_v26, %v294_v30  ;;  %v1296_v35 = vadd.f32 %v1295_v32, %v2813_v38  ;;  %v1297_v37 = vpop.f32.mrb[99].mxu0  ;;  %v1520_v39 = vpop.f32.mrb[98].mxu1  ;;  %v301_v26 = vld [vmem:[%s2671_s6 + $0xb8] sm:$0xff] }
 0x213   : > { %v1522_v41 = vpop.f32.mrb[99].mxu1 }
 0x214   : > { %1643 = vst.msk [vmem:[%s2671_s6 + $0x80] sm:$0xff] %vm245_vm0, %v1610_v7  ;;  %v1521_v31 = vadd.f32 %v1520_v39, %v1296_v35  ;;  %v302_v41 = vld [vmem:[%s2671_s6 + $0xc0] sm:$0xff] }
 0x215   : > { %v1300_v62 = vpop.f32.mrb[100].mxu0 }
 0x216   : > { %v1611_v34 = vadd.f32 %v1521_v31, %v295_v40  ;;  %v1301_v46 = vadd.f32 %v1300_v62, %v2815_v45  ;;  %v1302_v15 = vpop.f32.mrb[101].mxu0  ;;  %v1525_v47 = vpop.f32.mrb[100].mxu1 }
 0x217   : > { %v1527_v49 = vpop.f32.mrb[101].mxu1 }
 0x218   : > { %1644 = vst.msk [vmem:[%s2671_s6 + $0x88] sm:$0xff] %vm245_vm0, %v1611_v34  ;;  %v1526_v38 = vadd.f32 %v1525_v47, %v1301_v46 }
 0x219   : > { %v1305_v53 = vpop.f32.mrb[102].mxu0 }
 0x21a   : > { %v1612_v4 = vadd.f32 %v1526_v38, %v296_v48  ;;  %v1306_v55 = vadd.f32 %v1305_v53, %v2817_v50  ;;  %v1307_v43 = vpop.f32.mrb[103].mxu0  ;;  %v1530_v56 = vpop.f32.mrb[102].mxu1  ;;  %v303_v48 = vld [vmem:[%s2671_s6 + $0xc8] sm:$0xff] }
 0x21b   : > { %v1532_v58 = vpop.f32.mrb[103].mxu1 }
 0x21c   : > { %1645 = vst.msk [vmem:[%s2671_s6 + $0x90] sm:$0xff] %vm245_vm0, %v1612_v4  ;;  %v1531_v45 = vadd.f32 %v1530_v56, %v1306_v55  ;;  %v304_v56 = vld [vmem:[%s2671_s6 + $0xd0] sm:$0xff] }
 0x21d   : > { %v1310_v60 = vpop.f32.mrb[104].mxu0 }
 0x21e   : > { %v1613_v63 = vadd.f32 %v1531_v45, %v297_v24  ;;  %v1311_v10 = vadd.f32 %v1310_v60, %v2819_v57  ;;  %v1312_v2 = vpop.f32.mrb[105].mxu0  ;;  %v1535_v3 = vpop.f32.mrb[104].mxu1 }
 0x21f   : > { %v1537_v52 = vpop.f32.mrb[105].mxu1  ;;  %v305_v2 = vld [vmem:[%s2671_s6 + $0xd8] sm:$0xff] }
 0x220   : > { %1646 = vst.msk [vmem:[%s2671_s6 + $0x98] sm:$0xff] %vm245_vm0, %v1613_v63  ;;  %v1536_v50 = vadd.f32 %v1535_v3, %v1311_v10 }
 0x221   : > { %v1315_v33 = vpop.f32.mrb[106].mxu0 }
 0x222   : > { %v1614_v9 = vadd.f32 %v1536_v50, %v298_v6  ;;  %v1316_v11 = vadd.f32 %v1315_v33, %v2821_v1  ;;  %v1317_v14 = vpop.f32.mrb[107].mxu0  ;;  %v1540_v0 = vpop.f32.mrb[106].mxu1 }
 0x223   : > { %v1542_v17 = vpop.f32.mrb[107].mxu1 }
 0x224   : > { %1647 = vst.msk [vmem:[%s2671_s6 + $0xa0] sm:$0xff] %vm245_vm0, %v1614_v9  ;;  %v1541_v57 = vadd.f32 %v1540_v0, %v1316_v11  ;;  %v306_v11 = vld [vmem:[%s2671_s6 + $0xe0] sm:$0xff] }
 0x225   : > { %v1320_v18 = vpop.f32.mrb[108].mxu0 }
 0x226   : > { %v1615_v19 = vadd.f32 %v1541_v57, %v299_v16  ;;  %v1321_v44 = vadd.f32 %v1320_v18, %v2823_v8  ;;  %v1322_v61 = vpop.f32.mrb[109].mxu0  ;;  %v1545_v20 = vpop.f32.mrb[108].mxu1 }
 0x227   : > { %v1547_v23 = vpop.f32.mrb[109].mxu1 }
 0x228   : > { %1648 = vst.msk [vmem:[%s2671_s6 + $0xa8] sm:$0xff] %vm245_vm0, %v1615_v19  ;;  %v1546_v1 = vadd.f32 %v1545_v20, %v1321_v44  ;;  %v307_v19 = vld [vmem:[%s2671_s6 + $0xe8] sm:$0xff] }
 0x229   : > { %v1325_v25 = vpop.f32.mrb[110].mxu0 }
 0x22a   : > { %v1616_v27 = vadd.f32 %v1546_v1, %v300_v22  ;;  %v1326_v29 = vadd.f32 %v1325_v25, %v2825_v13  ;;  %v1327_v30 = vpop.f32.mrb[111].mxu0  ;;  %v1550_v54 = vpop.f32.mrb[110].mxu1  ;;  %v308_v25 = vld [vmem:[%s2671_s6 + $0xf0] sm:$0xff] }
 0x22b   : > { %v1552_v32 = vpop.f32.mrb[111].mxu1 }
 0x22c   : > { %1649 = vst.msk [vmem:[%s2671_s6 + $0xb0] sm:$0xff] %vm245_vm0, %v1616_v27  ;;  %v1551_v8 = vadd.f32 %v1550_v54, %v1326_v29 }
 0x22d   : > { %v1330_v7 = vpop.f32.mrb[112].mxu0 }
 0x22e   : > { %v1617_v35 = vadd.f32 %v1551_v8, %v301_v26  ;;  %v1331_v37 = vadd.f32 %v1330_v7, %v2827_v21  ;;  %v1332_v39 = vpop.f32.mrb[113].mxu0  ;;  %v1555_v40 = vpop.f32.mrb[112].mxu1  ;;  %v309_v8 = vld [vmem:[%s2671_s6 + $0xf8] sm:$0xff] }
 0x22f   : > { %v1557_v31 = vpop.f32.mrb[113].mxu1 }
 0x230   : > { %1650 = vst.msk [vmem:[%s2671_s6 + $0xb8] sm:$0xff] %vm245_vm0, %v1617_v35  ;;  %v1556_v13 = vadd.f32 %v1555_v40, %v1331_v37 }
 0x231   : > { %v1335_v62 = vpop.f32.mrb[114].mxu0 }
 0x232   : > { %v1618_v34 = vadd.f32 %v1556_v13, %v302_v41  ;;  %v1336_v46 = vadd.f32 %v1335_v62, %v2829_v28  ;;  %v1337_v15 = vpop.f32.mrb[115].mxu0  ;;  %v1560_v47 = vpop.f32.mrb[114].mxu1 }
 0x233   : > { %v1562_v49 = vpop.f32.mrb[115].mxu1 }
 0x234   : > { %1651 = vst.msk [vmem:[%s2671_s6 + $0xc0] sm:$0xff] %vm245_vm0, %v1618_v34  ;;  %v1561_v21 = vadd.f32 %v1560_v47, %v1336_v46 }
 0x235   : > { %v1340_v38 = vpop.f32.mrb[116].mxu0 }
 0x236   : > { %v1619_v53 = vadd.f32 %v1561_v21, %v303_v48  ;;  %v1341_v4 = vadd.f32 %v1340_v38, %v2831_v36  ;;  %v1342_v55 = vpop.f32.mrb[117].mxu0  ;;  %v1565_v43 = vpop.f32.mrb[116].mxu1 }
 0x237   : > { %v1567_v24 = vpop.f32.mrb[117].mxu1 }
 0x238   : > { %1652 = vst.msk [vmem:[%s2671_s6 + $0xc8] sm:$0xff] %vm245_vm0, %v1619_v53  ;;  %v1566_v28 = vadd.f32 %v1565_v43, %v1341_v4 }
 0x239   : > { %v1345_v58 = vpop.f32.mrb[118].mxu0 }
 0x23a   : > { %v1620_v45 = vadd.f32 %v1566_v28, %v304_v56  ;;  %v1346_v60 = vadd.f32 %v1345_v58, %v2833_v42  ;;  %v1347_v63 = vpop.f32.mrb[119].mxu0  ;;  %v1570_v10 = vpop.f32.mrb[118].mxu1 }
 0x23b   : > { %v1572_v3 = vpop.f32.mrb[119].mxu1 }
 0x23c   : > { %1653 = vst.msk [vmem:[%s2671_s6 + $0xd0] sm:$0xff] %vm245_vm0, %v1620_v45  ;;  %v1571_v36 = vadd.f32 %v1570_v10, %v1346_v60 }
 0x23d   : > { %v1350_v6 = vpop.f32.mrb[120].mxu0 }
 0x23e   : > { %v1621_v52 = vadd.f32 %v1571_v36, %v305_v2  ;;  %v1351_v50 = vadd.f32 %v1350_v6, %v2835_v51  ;;  %v1352_v33 = vpop.f32.mrb[121].mxu0  ;;  %v1575_v9 = vpop.f32.mrb[120].mxu1 }
 0x23f   : > { %v1577_v14 = vpop.f32.mrb[121].mxu1 }
 0x240   : > { %1654 = vst.msk [vmem:[%s2671_s6 + $0xd8] sm:$0xff] %vm245_vm0, %v1621_v52  ;;  %v1576_v42 = vadd.f32 %v1575_v9, %v1351_v50 }
 0x241   : > { %v1355_v0 = vpop.f32.mrb[122].mxu0 }
 0x242   : > { %v1622_v16 = vadd.f32 %v1576_v42, %v306_v11  ;;  %v1356_v17 = vadd.f32 %v1355_v0, %v2837_v59  ;;  %v1357_v57 = vpop.f32.mrb[123].mxu0  ;;  %v1580_v18 = vpop.f32.mrb[122].mxu1 }
 0x243   : > { %v1582_v44 = vpop.f32.mrb[123].mxu1 }
 0x244   : > { %1655 = vst.msk [vmem:[%s2671_s6 + $0xe0] sm:$0xff] %vm245_vm0, %v1622_v16  ;;  %v1581_v51 = vadd.f32 %v1580_v18, %v1356_v17 }
 0x245   : > { %v1360_v61 = vpop.f32.mrb[124].mxu0 }
 0x246   : > { %v1623_v20 = vadd.f32 %v1581_v51, %v307_v19  ;;  %v1361_v22 = vadd.f32 %v1360_v61, %v2839_v5  ;;  %v1362_v23 = vpop.f32.mrb[125].mxu0  ;;  %v1585_v1 = vpop.f32.mrb[124].mxu1 }
 0x247   : > { %v1587_v27 = vpop.f32.mrb[125].mxu1 }
 0x248   : > { %1656 = vst.msk [vmem:[%s2671_s6 + $0xe8] sm:$0xff] %vm245_vm0, %v1623_v20  ;;  %v1586_v59 = vadd.f32 %v1585_v1, %v1361_v22 }
 0x249   : > { %v1365_v29 = vpop.f32.mrb[126].mxu0 }
 0x24a   : > { %v1624_v30 = vadd.f32 %v1586_v59, %v308_v25  ;;  %v1366_v54 = vadd.f32 %v1365_v29, %v2841_v12  ;;  %v1367_v26 = vpop.f32.mrb[127].mxu0  ;;  %v1590_v32 = vpop.f32.mrb[126].mxu1 }
 0x24b   : > { %v1592_v7 = vpop.f32.mrb[127].mxu1 }
 0x24c   : > { %1657 = vst.msk [vmem:[%s2671_s6 + $0xf0] sm:$0xff] %vm245_vm0, %v1624_v30  ;;  %v1591_v35 = vadd.f32 %v1590_v32, %v1366_v54 }
 0x24e   : > { %v1625_v5 = vadd.f32 %v1591_v35, %v309_v8 }
 0x250   : > { %1658 = vst.msk [vmem:[%s2671_s6 + $0xf8] sm:$0xff] %vm245_vm0, %v1625_v5 }
 0x251 PF: > { %s15_s14 = sadd.s32 1, %s2126_s14   ;;  %s2995_s9 = smov %s2110_s10 }
 0x252   : > { %p12_p7 = scmp.ge.s32.totalorder %s15_s14, 4   ;;  %s2996_s10 = smov %s2114_s11 }
 0x253   : > { %s2997_s11 = smov %s2197_s21  ;;  %s2998_s12 = smov %s2122_s13 }
 0x254   : > { %s2999_s13 = smov %s3001_s16  ;;  %14 = sbr.rel (!%p12_p7) target bundleno = 4 (0x4), region = 75 }
 0x25b   :  { %1689 = vsyncpa [#allocation3], 1 }
 0x25c   :  { %1691 = vsyncpa [#allocation3 + $0x1], 1 }

</bundles_post_ra>
